<compile_context>
chip_gen: v7x
topology: tpu7x:2x2x1
jax: 0.10.0
libtpu: 0.0.40
codegen_flags: <defaults>
</compile_context>

<pallas_src>
import jax
import jax.numpy as jnp
import numpy as np
from jax.experimental import pallas as pl
from jax.experimental.pallas import tpu as pltpu

# ----------------------------------------------------------------------------
# Dimensions (Proj_Head: in_dim=400, inner_dim=512, out_dim=256 as in PyTorch)
# ----------------------------------------------------------------------------
C_IN = 400
C_PAD = 512       # C_IN zero-padded to a lane multiple of 128
C_INNER = 512
C_OUT = 256
BN_EPS = 1e-5
NORM_EPS = 1e-12  # F.normalize eps


# ----------------------------------------------------------------------------
# Pallas kernel: fused MLP2d (conv1x1 -> [folded BN] -> ReLU -> conv1x1)
#                + per-position L2 normalize over channels
# ----------------------------------------------------------------------------
def projector_kernel(x_ref, w1_ref, b1_ref, w2_ref, b2_ref, o_ref):
    # conv1x1 #1 (BN pre-folded into w1/b1): bf16 MXU matmul, f32 accumulate
    h = jnp.dot(x_ref[...], w1_ref[...], preferred_element_type=jnp.float32)
    h = jnp.maximum(h + b1_ref[...], 0.0)                      # bias + ReLU
    # conv1x1 #2
    y = jnp.dot(h.astype(jnp.bfloat16), w2_ref[...],
                preferred_element_type=jnp.float32)
    y = y + b2_ref[...]                                        # (TP, C_OUT) f32
    # F.normalize(dim=channel): y / max(||y||, eps) == y * rsqrt(max(ssq, eps^2))
    ssq = jnp.sum(y * y, axis=-1, keepdims=True)
    inv = jax.lax.rsqrt(jnp.maximum(ssq, NORM_EPS * NORM_EPS))
    o_ref[...] = y * inv


def _fold_params(params):
    """Fold eval-mode BN into the first conv's weight/bias; pad C_IN -> C_PAD;
    cast weights to bf16 (biases stay f32)."""
    scale = params["gamma"] * jax.lax.rsqrt(params["var"] + BN_EPS)  # (1, C_INNER)
    w1 = params["w1"] * scale                                        # (C_IN, C_INNER)
    b1 = (params["b1"] - params["mean"]) * scale + params["beta"]    # (1, C_INNER)
    w1 = jnp.pad(w1, ((0, C_PAD - C_IN), (0, 0))).astype(jnp.bfloat16)
    w2 = params["w2"].astype(jnp.bfloat16)                           # (C_INNER, C_OUT)
    return w1, b1, w2, params["b2"]


def _pick_row_tile(rows):
    # largest tile in {512, 256, 128} that still gives >= 2 grid steps
    for tp in (512, 256, 128):
        if rows >= 2 * tp:
            return tp
    return 128


def _const_spec(shape):
    return pl.BlockSpec(shape, lambda i: tuple(0 for _ in shape))


@jax.jit
def run_projector_batched(feats_nhwc, params):
    """feats_nhwc: (N, B, Hf, Wf, C_IN) f32 feature maps (channels-last),
    all projected by one parameter set in a single pallas_call.
    Returns (N, B, C_OUT, Hf, Wf) f32, L2-normalized along the channel axis
    (== F.normalize(projector(x), dim=1) in the PyTorch module)."""
    N, B, Hf, Wf, C = feats_nhwc.shape
    assert C == C_IN
    rows = N * B * Hf * Wf
    TP = _pick_row_tile(rows)
    P = ((rows + TP - 1) // TP) * TP                 # pad rows to tile multiple

    x = feats_nhwc.reshape(rows, C).astype(jnp.bfloat16)
    x = jnp.pad(x, ((0, P - rows), (0, C_PAD - C)))  # (P, C_PAD) bf16

    w1, b1, w2, b2 = _fold_params(params)

    out = pl.pallas_call(
        projector_kernel,
        out_shape=jax.ShapeDtypeStruct((P, C_OUT), jnp.float32),
        grid=(P // TP,),
        in_specs=[
            pl.BlockSpec((TP, C_PAD), lambda i: (i, 0)),   # activations
            _const_spec((C_PAD, C_INNER)),                 # w1 (BN folded, bf16)
            _const_spec((1, C_INNER)),                     # b1 (folded, f32)
            _const_spec((C_INNER, C_OUT)),                 # w2 (bf16)
            _const_spec((1, C_OUT)),                       # b2 (f32)
        ],
        out_specs=pl.BlockSpec((TP, C_OUT), lambda i: (i, 0)),
        compiler_params=pltpu.CompilerParams(
            dimension_semantics=("parallel",),
            vmem_limit_bytes=32 * 1024 * 1024),
    )(x, w1, b1, w2, b2)

    out = out[:rows].reshape(N, B, Hf, Wf, C_OUT)
    # single final transpose to match the PyTorch NCHW output layout
    return jnp.transpose(out, (0, 1, 4, 2, 3))


def projector_ref(feats_nhwc, params):
    """Pure-JAX f32 reference of the fused kernel (for the correctness check)."""
    N, B, Hf, Wf, C = feats_nhwc.shape
    x = feats_nhwc.reshape(-1, C)
    h = x @ params["w1"] + params["b1"]
    h = (h - params["mean"]) / jnp.sqrt(params["var"] + BN_EPS)
    h = h * params["gamma"] + params["beta"]
    h = jnp.maximum(h, 0.0)
    y = h @ params["w2"] + params["b2"]
    n = jnp.maximum(jnp.sqrt(jnp.sum(y * y, -1, keepdims=True)), NORM_EPS)
    y = (y / n).reshape(N, B, Hf, Wf, C_OUT)
    return jnp.transpose(y, (0, 1, 4, 2, 3))


# ----------------------------------------------------------------------------
# Deterministic stub encoders (stand-ins for resnet / swin / aspp / proj1-3),
# kept channels-last end-to-end so no NCHW<->NHWC round trips surround the
# Pallas projector call.
# ----------------------------------------------------------------------------
def avg_pool_nhwc(x, k):
    B, H, W, C = x.shape
    return x.reshape(B, H // k, k, W // k, k, C).mean(axis=(2, 4))


def branch_features(seq, enc):
    """seq: (B, T, 3, H, W) NCHW video  ->  (B, H/4, W/4, 400) channels-last.
    Mirrors the structure of the PyTorch forward's per-view branch."""
    s = jnp.transpose(seq, (0, 1, 3, 4, 2))          # (B, T, H, W, 3)
    T = s.shape[1]
    # encoder_1 applied per frame, stacked on a time axis
    frames = [avg_pool_nhwc(s[:, i], 4) @ enc["w_e1"] for i in range(T)]
    encoded_seq = jnp.stack(frames, axis=1)          # (B, T, H/4, W/4, 32)
    res_output = encoded_seq[:, -1]                  # last frame
    # encoder_2 (temporal swin stub): two temporal streams
    tem_seq_1 = encoded_seq @ enc["w_e2a"]           # (B, T, H/4, W/4, 48)
    pooled = jnp.stack([avg_pool_nhwc(encoded_seq[:, i], 2) for i in range(T)], 1)
    tem_seq_2 = pooled @ enc["w_e2b"]                # (B, T, H/8, W/8, 64)
    tem_output_1 = tem_seq_1[:, -1]
    tem_output_2 = tem_seq_2[:, -1]
    # encoder_3 (aspp stub)
    aspp_output = tem_output_2 @ enc["w_e3"]         # (B, H/8, W/8, 80)
    # proj1 / proj2 / proj3 (1x1 convs)
    res_output_pro = res_output @ enc["w_p1"]        # (B, H/4, W/4, 128)
    tem_output_1_pro = tem_output_1 @ enc["w_p2"]    # (B, H/4, W/4,  96)
    tem_output_2_pro = tem_output_2 @ enc["w_p3"]    # (B, H/8, W/8,  96)
    # bilinear upsample (align_corners=False / half-pixel) + channel concat
    hw = res_output_pro.shape[1:3]
    tem_output_2_pro = jax.image.resize(
        tem_output_2_pro,
        (tem_output_2_pro.shape[0],) + hw + (tem_output_2_pro.shape[3],),
        method="bilinear")
    aspp_output = jax.image.resize(
        aspp_output, (aspp_output.shape[0],) + hw + (aspp_output.shape[3],),
        method="bilinear")
    return jnp.concatenate(
        [res_output_pro, tem_output_1_pro, tem_output_2_pro, aspp_output],
        axis=-1)                                     # (B, H/4, W/4, 400)


# ----------------------------------------------------------------------------
# Momentum update (key branch), cosine schedule as in _momentum_update_key_encoder
# ----------------------------------------------------------------------------
def momentum_update(params_q, params_k, k_step, K_total, base_momentum):
    m = 1.0 - (1.0 - base_momentum) * (np.cos(np.pi * k_step / K_total) + 1.0) / 2.0
    return jax.tree.map(lambda pk, pq: pk * m + pq * (1.0 - m),
                        params_k, params_q)


# ----------------------------------------------------------------------------
# Full PixPro forward
# ----------------------------------------------------------------------------
def pixpro_forward(seqs, enc_q, enc_k, proj_q, proj_k, k_step, K_total,
                   base_momentum):
    seq_1, seq_2 = seqs[0], seqs[1]
    # query branch (gradient path in PyTorch): both views in ONE projector call
    q_feats = jnp.stack([branch_features(seq_1, enc_q),
                         branch_features(seq_2, enc_q)], axis=0)
    preds = run_projector_batched(q_feats, proj_q)
    pred_1, pred_2 = preds[0], preds[1]
    # momentum update of key encoder / projector, then key branch (no-grad):
    # all six views in ONE projector call
    enc_k = momentum_update(enc_q, enc_k, k_step, K_total, base_momentum)
    proj_k = momentum_update(proj_q, proj_k, k_step, K_total, base_momentum)
    k_feats = jnp.stack([branch_features(s, enc_k) for s in seqs], axis=0)
    key_outs = run_projector_batched(k_feats, proj_k)
    (proj_1_ng, proj_2_ng, proj_adj1_ng,
     proj_adj2_ng, proj_adj3_ng, proj_neg3_ng) = (key_outs[i] for i in range(6))
    return (pred_1, pred_2, proj_1_ng, proj_2_ng,
            proj_adj1_ng, proj_adj2_ng, proj_adj3_ng, proj_neg3_ng)


# ----------------------------------------------------------------------------
# Deterministic parameter construction
# ----------------------------------------------------------------------------
def make_params():
    key = jax.random.PRNGKey(0)
    ks = jax.random.split(key, 20)
    f = lambda k, s, scale=0.05: (scale * jax.random.normal(k, s)).astype(jnp.float32)
    enc = {
        "w_e1": f(ks[0], (3, 32)),
        "w_e2a": f(ks[1], (32, 48)),
        "w_e2b": f(ks[2], (32, 64)),
        "w_e3": f(ks[3], (64, 80)),
        "w_p1": f(ks[4], (32, 128)),
        "w_p2": f(ks[5], (48, 96)),
        "w_p3": f(ks[6], (64, 96)),
    }
    proj = {
        "w1": f(ks[7], (C_IN, C_INNER)),
        "b1": f(ks[8], (1, C_INNER), 0.02),
        "gamma": (1.0 + 0.1 * jax.random.normal(ks[9], (1, C_INNER))).astype(jnp.float32),
        "beta": f(ks[10], (1, C_INNER), 0.02),
        "mean": f(ks[11], (1, C_INNER), 0.01),
        "var": (1.0 + 0.1 * jax.random.uniform(ks[12], (1, C_INNER))).astype(jnp.float32),
        "w2": f(ks[13], (C_INNER, C_OUT)),
        "b2": f(ks[14], (1, C_OUT), 0.02),
    }
    return enc, proj


if __name__ == "__main__":
    B, T, C, H, W = 2, 4, 3, 32, 32   # small shapes; feature grid = 8x8
    key = jax.random.PRNGKey(0)
    seq_keys = jax.random.split(key, 6)
    seqs = tuple(jax.random.normal(k, (B, T, C, H, W), dtype=jnp.float32)
                 for k in seq_keys)

    enc_q, proj_q = make_params()
    # key branch initialized as a copy of the query branch (as in PyTorch __init__)
    enc_k = jax.tree.map(lambda x: x, enc_q)
    proj_k = jax.tree.map(lambda x: x, proj_q)

    # hyper-parameters implied by args (momentum schedule)
    K_total, k_step, base_momentum = 100, 3, 0.99

    outs = pixpro_forward(seqs, enc_q, enc_k, proj_q, proj_k,
                          k_step, K_total, base_momentum)
    outs = jax.block_until_ready(outs)

    # sanity: fused bf16 Pallas projector vs pure-JAX f32 reference (query pair)
    q_feats = jnp.stack([branch_features(seqs[0], enc_q),
                         branch_features(seqs[1], enc_q)], axis=0)
    got = jax.block_until_ready(run_projector_batched(q_feats, proj_q))
    want = jax.block_until_ready(projector_ref(q_feats, proj_q))
    np.testing.assert_allclose(np.asarray(got), np.asarray(want),
                               rtol=3e-2, atol=5e-3)

    assert len(outs) == 8
    for o in outs:
        assert o.shape == (B, C_OUT, H // 4, W // 4)

    print("KERNEL_OK")
</pallas_src>

<mosaic_0001>
module attributes {stable_mosaic.version = 11 : i64} {
  func.func @projector_kernel(%arg0: i32, %arg1: memref<128x512xbf16, #tpu.memory_space<vmem>>, %arg2: memref<512x512xbf16, #tpu.memory_space<vmem>>, %arg3: memref<1x512xf32, #tpu.memory_space<vmem>>, %arg4: memref<512x256xbf16, #tpu.memory_space<vmem>>, %arg5: memref<1x256xf32, #tpu.memory_space<vmem>>, %arg6: memref<128x256xf32, #tpu.memory_space<vmem>>) attributes {dimension_semantics = [#tpu.dimension_semantics<parallel>], iteration_bounds = array<i64: 2>, scalar_prefetch = 0 : i64, scratch_operands = 0 : i64, tpu.core_type = #tpu.core_type<tc>, window_params = [{transform_indices = @transform_0, window_bounds = array<i64: 128, 512>}, {pipeline_mode = #tpu.pipeline_mode<synchronous>, transform_indices = @transform_1, window_bounds = array<i64: 512, 512>}, {pipeline_mode = #tpu.pipeline_mode<synchronous>, transform_indices = @transform_2, window_bounds = array<i64: 1, 512>}, {pipeline_mode = #tpu.pipeline_mode<synchronous>, transform_indices = @transform_3, window_bounds = array<i64: 512, 256>}, {pipeline_mode = #tpu.pipeline_mode<synchronous>, transform_indices = @transform_4, window_bounds = array<i64: 1, 256>}, {transform_indices = @transform_5, window_bounds = array<i64: 128, 256>}]} {
    %c0 = arith.constant 0 : index
    %c0_0 = arith.constant 0 : index
    %0 = vector.load %arg1[%c0, %c0_0] : memref<128x512xbf16, #tpu.memory_space<vmem>>, vector<128x512xbf16>
    %c0_1 = arith.constant 0 : index
    %c0_2 = arith.constant 0 : index
    %1 = vector.load %arg2[%c0_1, %c0_2] : memref<512x512xbf16, #tpu.memory_space<vmem>>, vector<512x512xbf16>
    %cst = arith.constant dense<0.000000e+00> : vector<128x512xf32>
    %2 = tpu.matmul %0, %1, %cst {dimension_numbers = #tpu.dot_dimension_numbers<[1], [0], [0], [1], [0, 0, 1, 1], [], []>} : vector<128x512xbf16>, vector<512x512xbf16>, vector<128x512xf32> -> vector<128x512xf32>
    %c0_3 = arith.constant 0 : index
    %c0_4 = arith.constant 0 : index
    %3 = vector.load %arg3[%c0_3, %c0_4] : memref<1x512xf32, #tpu.memory_space<vmem>>, vector<1x512xf32>
    %4 = vector.broadcast %3 : vector<1x512xf32> to vector<128x512xf32>
    %5 = arith.addf %2, %4 : vector<128x512xf32>
    %cst_5 = arith.constant 0.000000e+00 : f32
    %6 = vector.broadcast %cst_5 : f32 to vector<128x512xf32>
    %7 = arith.maximumf %5, %6 : vector<128x512xf32>
    %8 = arith.truncf %7 : vector<128x512xf32> to vector<128x512xbf16>
    %c0_6 = arith.constant 0 : index
    %c0_7 = arith.constant 0 : index
    %9 = vector.load %arg4[%c0_6, %c0_7] : memref<512x256xbf16, #tpu.memory_space<vmem>>, vector<512x256xbf16>
    %cst_8 = arith.constant dense<0.000000e+00> : vector<128x256xf32>
    %10 = tpu.matmul %8, %9, %cst_8 {dimension_numbers = #tpu.dot_dimension_numbers<[1], [0], [0], [1], [0, 0, 1, 1], [], []>} : vector<128x512xbf16>, vector<512x256xbf16>, vector<128x256xf32> -> vector<128x256xf32>
    %c0_9 = arith.constant 0 : index
    %c0_10 = arith.constant 0 : index
    %11 = vector.load %arg5[%c0_9, %c0_10] : memref<1x256xf32, #tpu.memory_space<vmem>>, vector<1x256xf32>
    %12 = vector.broadcast %11 : vector<1x256xf32> to vector<128x256xf32>
    %13 = arith.addf %10, %12 : vector<128x256xf32>
    %14 = arith.mulf %13, %13 : vector<128x256xf32>
    %cst_11 = arith.constant dense<0.000000e+00> : vector<128xf32>
    %15 = vector.multi_reduction <add>, %14, %cst_11 [1] : vector<128x256xf32> to vector<128xf32>
    %16 = vector.shape_cast %15 : vector<128xf32> to vector<128x1xf32>
    %cst_12 = arith.constant 1.000000e-24 : f32
    %17 = vector.broadcast %cst_12 : f32 to vector<128x1xf32>
    %18 = arith.maximumf %16, %17 : vector<128x1xf32>
    %19 = math.rsqrt %18 : vector<128x1xf32>
    %20 = vector.broadcast %19 : vector<128x1xf32> to vector<128x256xf32>
    %21 = arith.mulf %13, %20 : vector<128x256xf32>
    %c0_13 = arith.constant 0 : index
    %c0_14 = arith.constant 0 : index
    %22 = vector.load %arg6[%c0_13, %c0_14] : memref<128x256xf32, #tpu.memory_space<vmem>>, vector<128x256xf32>
    tpu.vector_store %arg6[%c0_13, %c0_14], %21 {strides = array<i32>} : memref<128x256xf32, #tpu.memory_space<vmem>>, vector<128x256xf32>,
    return
  }
  func.func @transform_0(%arg0: i32) -> (i32, i32) {
    %c0_i32 = arith.constant 0 : i32
    %c0_i32_0 = arith.constant 0 : i32
    return %arg0, %c0_i32 : i32, i32
  }
  func.func @transform_1(%arg0: i32) -> (i32, i32) {
    %c0_i32 = arith.constant 0 : i32
    %c0_i32_0 = arith.constant 0 : i32
    %c0_i32_1 = arith.constant 0 : i32
    return %c0_i32, %c0_i32_0 : i32, i32
  }
  func.func @transform_2(%arg0: i32) -> (i32, i32) {
    %c0_i32 = arith.constant 0 : i32
    %c0_i32_0 = arith.constant 0 : i32
    %c0_i32_1 = arith.constant 0 : i32
    return %c0_i32, %c0_i32_0 : i32, i32
  }
  func.func @transform_3(%arg0: i32) -> (i32, i32) {
    %c0_i32 = arith.constant 0 : i32
    %c0_i32_0 = arith.constant 0 : i32
    %c0_i32_1 = arith.constant 0 : i32
    return %c0_i32, %c0_i32_0 : i32, i32
  }
  func.func @transform_4(%arg0: i32) -> (i32, i32) {
    %c0_i32 = arith.constant 0 : i32
    %c0_i32_0 = arith.constant 0 : i32
    %c0_i32_1 = arith.constant 0 : i32
    return %c0_i32, %c0_i32_0 : i32, i32
  }
  func.func @transform_5(%arg0: i32) -> (i32, i32) {
    %c0_i32 = arith.constant 0 : i32
    %c0_i32_0 = arith.constant 0 : i32
    return %arg0, %c0_i32 : i32, i32
  }
}

</mosaic_0001>

<bundles_post_ra>
// kernel: run_projector_batched.1
= control target key start
LH: loop header
LB: loop body
LE: loop exit
PB: predicated region body
PF: predicated region fallthrough
CT: control target
= control target key end

     0   :  { %10 = vsyncpa [#allocation3], 0  ;;  %s4746_s0 = inlined_call_operand.vmem [shape: bf16[256,512], index: 0, kind: input, shape index: {}]   ;;  %s4747_s1 = inlined_call_operand.vmem [shape: bf16[512,512], index: 1, kind: input, shape index: {}]   ;;  %s4748_s2 = inlined_call_operand.vmem [shape: f32[1,512], index: 2, kind: input, shape index: {}]   ;;  %s4749_s3 = inlined_call_operand.vmem [shape: bf16[512,256], index: 3, kind: input, shape index: {}]   ;;  %s4750_s4 = inlined_call_operand.vmem [shape: f32[1,256], index: 4, kind: input, shape index: {}]   ;;  %s4751_s5 = inlined_call_operand.hbm [shape: f32[256,256], index: 5, kind: output, shape index: {}]  }
   0x1   :  { %12 = vsyncpa [#allocation3 + $0x1], 0  ;;  %s3573_s18 = smov 0   ;;  %s3575_s19 = smov 0  }
   0x2   :  { %s3577_s20 = smov 0   ;;  %s3579_s21 = smov 0  }
   0x3 LB: > { %s3594_s22 = sadd.s32 4294967295, %s3538_s21   ;;  %s2634_s23 = sadd.s32 4294967294, %s3538_s21   ;;  %s3538_s21 = sphi %s3579_s21, %s4757_s21   ;;  %s3534_s20 = sphi %s3577_s20, %s4756_s20   ;;  %s3530_s19 = sphi %s3575_s19, %s4755_s19   ;;  %s3526_s18 = sphi %s3573_s18, %s4754_s18  }
   0x4   : > { %s3598_s24 = sadd.s32 1, %s3538_s21   ;;  %s135_s25 = sadd.s32 1, %s3534_s20 }
   0x5   : > { %s132_s26 = ssub.s32 %s3538_s21, %s3598_s24  ;;  %p145_p0 = scmp.ne.s32.totalorder %s3534_s20, %s3530_s19 }
   0x6   : > { %p133_p1 = scmp.eq.s32.totalorder %s132_s26, 0  ;;  %p146_p2 = scmp.eq.s32.totalorder %s3594_s22, 1 }
   0x7   : > { %p151_p3 = scmp.ne.s32.totalorder %s3530_s19, %s3526_s18  ;;  %p152_p4 = scmp.eq.s32.totalorder %s2634_s23, 1 }
   0x8   : > { %s3609_s27 = scalar_select %p133_p1, %s3534_s20, %s135_s25  }
   0x9   : > { %p3611_p5 = por %p146_p2, %p145_p0  ;;  %p3615_p6 = por %p152_p4, %p151_p3 }
   0xa   : > { %p2637_p7 = scmp.ge.s32.totalorder %s3538_s21, 1  ;;  %p192_p8 = scmp.lt.s32.totalorder %s3538_s21, 3 }
   0xc   : > { %p193_p9 = pnand %p2637_p7, %p192_p8 }
   0xd   : > { %v3108_v0 = vld [vmem:[%s4747_s1 + $0x4] ss:$16 sps:$4 sm:$0xff] (!%p193_p9)   ;;  %v3110_v1 = vld [vmem:[%s4747_s1] ss:$16 sps:$4 sm:$0xff] (!%p193_p9)   ;;  %s2639_s17 = sshll.u32 (!%p193_p9), %s3594_s22, 4  ;;  %s218_s6 = sand.u32 (!%p193_p9), 1, %s3530_s19  }
   0xe   : > { %196 = sbr.rel (%p193_p9) target bundleno = 877 (0x36d), region = 40  ;;  %1211 = vmatprep.subr.bf16.mxu1 (!%p193_p9), %v3108_v0  ;;  %v3111_v2 = vld [vmem:[%s4747_s1 + $0x204] ss:$16 sps:$4 sm:$0xff] (!%p193_p9)   ;;  %v3113_v3 = vld [vmem:[%s4747_s1 + $0x200] ss:$16 sps:$4 sm:$0xff] (!%p193_p9)   ;;  %p222_p10 = scmp.lt.s32.totalorder (!%p193_p9), %s2639_s17, 31 }
   0xf   : > { %1212 = vmatpush1.bf16.msra.mxu1 (!%p193_p9), %v3110_v1  ;;  %v3114_v4 = vld [vmem:[%s4747_s1 + $0x24] ss:$16 sps:$4 sm:$0xff] (!%p193_p9)   ;;  %v3116_v5 = vld [vmem:[%s4747_s1 + $0x20] ss:$16 sps:$4 sm:$0xff] (!%p193_p9)   ;;  %1324 = vmatprep.subr.bf16.mxu0 (!%p193_p9), %v3111_v2  ;;  %v3209_v1 = vld [vmem:[%s4747_s1 + $0xc] ss:$16 sps:$4 sm:$0xff] (!%p193_p9)  }
  0x10   : > { %v3117_v6 = vld [vmem:[%s4747_s1 + $0x224] ss:$16 sps:$4 sm:$0xff] (!%p193_p9)   ;;  %1325 = vmatpush1.bf16.msra.mxu0 (!%p193_p9), %v3113_v3  ;;  %1213 = vmatprep.subr.bf16.mxu1 (!%p193_p9), %v3114_v4  ;;  %v3119_v7 = vld [vmem:[%s4747_s1 + $0x220] ss:$16 sps:$4 sm:$0xff] (!%p193_p9)   ;;  %v3207_v4 = vld [vmem:[%s4747_s1 + $0x8] ss:$16 sps:$4 sm:$0xff] (!%p193_p9)  }
  0x11   : > { %1326 = vmatprep.subr.bf16.mxu0 (!%p193_p9), %v3117_v6  ;;  %v3120_v8 = vld [vmem:[%s4747_s1 + $0x44] ss:$16 sps:$4 sm:$0xff] (!%p193_p9)   ;;  %v3122_v9 = vld [vmem:[%s4747_s1 + $0x40] ss:$16 sps:$4 sm:$0xff] (!%p193_p9)   ;;  %s2638_s7 = sshll.u32 (!%p193_p9), %s218_s6, 8  ;;  %s3540_s15 = smov (!%p193_p9), [#allocation2]  }
  0x12   : > { %v3123_v10 = vld [vmem:[%s4747_s1 + $0x244] ss:$16 sps:$4 sm:$0xff] (!%p193_p9)   ;;  %v3125_v12 = vld [vmem:[%s4747_s1 + $0x240] ss:$16 sps:$4 sm:$0xff] (!%p193_p9)   ;;  %s4630_s8 = scalar_lea.vmem (!%p193_p9), [#allocation2], %s2638_s7  ;;  %s3480_s16 = sshll.u32 (!%p193_p9), %s3540_s15, 4  ;;  %s3481_s16 = int_to_ptr.vmem [resolvable:$false] %s3480_s16 }
  0x13   : > { %1214 = vmatpush1.bf16.msra.mxu1 (!%p193_p9), %v3116_v5  ;;  %v3126_v11 = vld [vmem:[%s4747_s1 + $0x64] ss:$16 sps:$4 sm:$0xff] (!%p193_p9)   ;;  %v3128_v14 = vld [vmem:[%s4747_s1 + $0x60] ss:$16 sps:$4 sm:$0xff] (!%p193_p9)   ;;  %s2572_s10 = sshll.u32 (!%p193_p9), %s4630_s8, 4  ;;  %s3482_s23 = scalar_lea.vmem (!%p193_p9), %s3481_s16, 8192  ;;  %s4695_s10 = int_to_ptr.vmem [resolvable:$true] %s2572_s10 }
  0x14   : > { %1215 = vmatprep.subr.bf16.mxu1 (!%p193_p9), %v3120_v8  ;;  %1327 = vmatpush1.bf16.msra.mxu0 (!%p193_p9), %v3119_v7  ;;  %v3129_v13 = vld [vmem:[%s4747_s1 + $0x264] ss:$16 sps:$4 sm:$0xff] (!%p193_p9)   ;;  %v3131_v16 = vld [vmem:[%s4747_s1 + $0x260] ss:$16 sps:$4 sm:$0xff] (!%p193_p9)   ;;  %v3215_v7 = vld [vmem:[%s4747_s1 + $0x2c] ss:$16 sps:$4 sm:$0xff] (!%p193_p9)   ;;  %p3483_p0 = scmp.lt.s32.totalorder (!%p193_p9), %s4695_s10, %s3481_s16 }
  0x15   : > { %1328 = vmatprep.subr.bf16.mxu0 %v3123_v10  ;;  %v3132_v15 = vld [vmem:[%s4747_s1 + $0x84] ss:$16 sps:$4 sm:$0xff]   ;;  %v3134_v18 = vld [vmem:[%s4747_s1 + $0x80] ss:$16 sps:$4 sm:$0xff]   ;;  %s4759_s17 = smov (!%p222_p10, %s2639_s17), 31  ;;  %s3476_s14 = scalar_lea.vmem %s4695_s10, 4096 }
  0x16   : > { %v3135_v17 = vld [vmem:[%s4747_s1 + $0x284] ss:$16 sps:$4 sm:$0xff]   ;;  %v3137_v20 = vld [vmem:[%s4747_s1 + $0x280] ss:$16 sps:$4 sm:$0xff]   ;;  %s2872_s9 = sshll.u32 %s4759_s17, 4  ;;  %p3477_p11 = scmp.ne.s32.totalorder %s4695_s10, %s3476_s14 }
  0x17   : > { %1216 = vmatpush1.bf16.msra.mxu1 %v3122_v9  ;;  %v3138_v19 = vld [vmem:[%s4747_s1 + $0xa4] ss:$16 sps:$4 sm:$0xff]   ;;  %v3140_v22 = vld [vmem:[%s4747_s1 + $0xa0] ss:$16 sps:$4 sm:$0xff]   ;;  %s3757_s25 = scalar_lea.vmem %s4746_s0, %s2872_s9  ;;  %v3213_v9 = vld [vmem:[%s4747_s1 + $0x28] ss:$16 sps:$4 sm:$0xff]   ;;  %p3484_p1 = scmp.lt.s32.totalorder %s3482_s23, %s3476_s14 }
  0x18   : > { %1217 = vmatprep.subr.bf16.mxu1 %v3126_v11  ;;  %1329 = vmatpush1.bf16.msra.mxu0 %v3125_v12  ;;  %v3141_v21 = vld [vmem:[%s4747_s1 + $0x2a4] ss:$16 sps:$4 sm:$0xff]   ;;  %v3143_v24 = vld [vmem:[%s4747_s1 + $0x2a0] ss:$16 sps:$4 sm:$0xff]   ;;  %v3782_v51 = vld [vmem:[%s3757_s25 + $0xc] ss:$16 sps:$4 sm:$0xff]   ;;  %p3478_p12 = pnand %p3477_p11, %p3611_p5 }
  0x19   : > { %1330 = vmatprep.subr.bf16.mxu0 %v3129_v13  ;;  %v3144_v23 = vld [vmem:[%s4747_s1 + $0xc4] ss:$16 sps:$4 sm:$0xff]   ;;  %v3146_v26 = vld [vmem:[%s4747_s1 + $0xc0] ss:$16 sps:$4 sm:$0xff]   ;;  %1356 = vmatprep.mubr.bf16.mxu0 %v3782_v51  ;;  %v3837_v5 = vld [vmem:[%s3757_s25 + $0x8] ss:$16 sps:$4 sm:$0xff]   ;;  %p3485_p2 = por %p3484_p1, %p3483_p0 }
  0x1a   : > { %v3147_v25 = vld [vmem:[%s4747_s1 + $0x2c4] ss:$16 sps:$4 sm:$0xff]   ;;  %v3149_v28 = vld [vmem:[%s4747_s1 + $0x2c0] ss:$16 sps:$4 sm:$0xff]   ;;  %v3846_v8 = vld [vmem:[%s3757_s25 + $0x2c] ss:$16 sps:$4 sm:$0xff]   ;;  %p3479_p13 = pneg %p3478_p12 }
  0x1b   : > { %1218 = vmatpush1.bf16.msra.mxu1 %v3128_v14  ;;  %v3150_v27 = vld [vmem:[%s4747_s1 + $0xe4] ss:$16 sps:$4 sm:$0xff]   ;;  %v3152_v30 = vld [vmem:[%s4747_s1 + $0xe0] ss:$16 sps:$4 sm:$0xff]   ;;  %v3221_v10 = vld [vmem:[%s4747_s1 + $0x4c] ss:$16 sps:$4 sm:$0xff]  }
  0x1c   : > { %1219 = vmatprep.subr.bf16.mxu1 %v3132_v15  ;;  %1331 = vmatpush1.bf16.msra.mxu0 %v3131_v16  ;;  %v3153_v29 = vld [vmem:[%s4747_s1 + $0x2e4] ss:$16 sps:$4 sm:$0xff]   ;;  %v3155_v32 = vld [vmem:[%s4747_s1 + $0x2e0] ss:$16 sps:$4 sm:$0xff]   ;;  %v3219_v12 = vld [vmem:[%s4747_s1 + $0x48] ss:$16 sps:$4 sm:$0xff]   ;;  %p3486_p3 = pnand %p3485_p2, %p3479_p13 }
  0x1d   : > { %1332 = vmatprep.subr.bf16.mxu0 %v3135_v17  ;;  %v3156_v31 = vld [vmem:[%s4747_s1 + $0x104] ss:$16 sps:$4 sm:$0xff]   ;;  %v3158_v34 = vld [vmem:[%s4747_s1 + $0x100] ss:$16 sps:$4 sm:$0xff]   ;;  %v3865_v13 = vld [vmem:[%s3757_s25 + $0x28] ss:$16 sps:$4 sm:$0xff]  }
  0x1e   : > { %v3159_v33 = vld [vmem:[%s4747_s1 + $0x304] ss:$16 sps:$4 sm:$0xff]   ;;  %v3161_v36 = vld [vmem:[%s4747_s1 + $0x300] ss:$16 sps:$4 sm:$0xff]   ;;  %v3227_v15 = vld [vmem:[%s4747_s1 + $0x6c] ss:$16 sps:$4 sm:$0xff]  }
  0x1f   : > { %1220 = vmatpush1.bf16.msra.mxu1 %v3134_v18  ;;  %v3162_v35 = vld [vmem:[%s4747_s1 + $0x124] ss:$16 sps:$4 sm:$0xff]   ;;  %v3164_v38 = vld [vmem:[%s4747_s1 + $0x120] ss:$16 sps:$4 sm:$0xff]   ;;  %v3874_v16 = vld [vmem:[%s3757_s25 + $0x4c] ss:$16 sps:$4 sm:$0xff]  }
  0x20   : > { %1221 = vmatprep.subr.bf16.mxu1 %v3138_v19  ;;  %1333 = vmatpush1.bf16.msra.mxu0 %v3137_v20  ;;  %v3165_v37 = vld [vmem:[%s4747_s1 + $0x324] ss:$16 sps:$4 sm:$0xff]   ;;  %v3167_v40 = vld [vmem:[%s4747_s1 + $0x320] ss:$16 sps:$4 sm:$0xff]   ;;  %v3225_v17 = vld [vmem:[%s4747_s1 + $0x68] ss:$16 sps:$4 sm:$0xff]  }
  0x21   : > { %1334 = vmatprep.subr.bf16.mxu0 %v3141_v21  ;;  %v3168_v39 = vld [vmem:[%s4747_s1 + $0x144] ss:$16 sps:$4 sm:$0xff]   ;;  %v3170_v42 = vld [vmem:[%s4747_s1 + $0x140] ss:$16 sps:$4 sm:$0xff]   ;;  %v3233_v18 = vld [vmem:[%s4747_s1 + $0x8c] ss:$16 sps:$4 sm:$0xff]  }
  0x22   : > { %v3171_v41 = vld [vmem:[%s4747_s1 + $0x344] ss:$16 sps:$4 sm:$0xff]   ;;  %v3173_v44 = vld [vmem:[%s4747_s1 + $0x340] ss:$16 sps:$4 sm:$0xff]   ;;  %v3231_v20 = vld [vmem:[%s4747_s1 + $0x88] ss:$16 sps:$4 sm:$0xff]  }
  0x23   : > { %1222 = vmatpush1.bf16.msra.mxu1 %v3140_v22  ;;  %v3174_v43 = vld [vmem:[%s4747_s1 + $0x164] ss:$16 sps:$4 sm:$0xff]   ;;  %v3176_v46 = vld [vmem:[%s4747_s1 + $0x160] ss:$16 sps:$4 sm:$0xff]   ;;  %v3893_v21 = vld [vmem:[%s3757_s25 + $0x48] ss:$16 sps:$4 sm:$0xff]  }
  0x24   : > { %1223 = vmatprep.subr.bf16.mxu1 %v3144_v23  ;;  %1335 = vmatpush1.bf16.msra.mxu0 %v3143_v24  ;;  %v3177_v45 = vld [vmem:[%s4747_s1 + $0x364] ss:$16 sps:$4 sm:$0xff]   ;;  %v3179_v49 = vld [vmem:[%s4747_s1 + $0x360] ss:$16 sps:$4 sm:$0xff]   ;;  %v3239_v23 = vld [vmem:[%s4747_s1 + $0xac] ss:$16 sps:$4 sm:$0xff]  }
  0x25   : > { %1336 = vmatprep.subr.bf16.mxu0 %v3147_v25  ;;  %v3769_v47 = vld [vmem:[%s3757_s25 + $0x4] ss:$16 sps:$4 sm:$0xff]   ;;  %v3182_v52 = vld [vmem:[%s4747_s1 + $0x180] ss:$16 sps:$4 sm:$0xff]   ;;  %v3902_v24 = vld [vmem:[%s3757_s25 + $0x6c] ss:$16 sps:$4 sm:$0xff]  }
  0x26   : > { %v3180_v48 = vld [vmem:[%s4747_s1 + $0x184] ss:$16 sps:$4 sm:$0xff]   ;;  %1243 = vmatprep.mubr.bf16.mxu1 %v3769_v47  ;;  %v3185_v54 = vld [vmem:[%s4747_s1 + $0x380] ss:$16 sps:$4 sm:$0xff]   ;;  %v3237_v25 = vld [vmem:[%s4747_s1 + $0xa8] ss:$16 sps:$4 sm:$0xff]  }
  0x27   : > { %1224 = vmatpush1.bf16.msra.mxu1 %v3146_v26  ;;  %v3183_v50 = vld [vmem:[%s4747_s1 + $0x384] ss:$16 sps:$4 sm:$0xff]   ;;  %v3188_v56 = vld [vmem:[%s4747_s1 + $0x1a0] ss:$16 sps:$4 sm:$0xff]   ;;  %v3245_v26 = vld [vmem:[%s4747_s1 + $0xcc] ss:$16 sps:$4 sm:$0xff]  }
  0x28   : > { %1225 = vmatprep.subr.bf16.mxu1 %v3150_v27  ;;  %1337 = vmatpush1.bf16.msra.mxu0 %v3149_v28  ;;  %v3186_v53 = vld [vmem:[%s4747_s1 + $0x1a4] ss:$16 sps:$4 sm:$0xff]   ;;  %v3191_v58 = vld [vmem:[%s4747_s1 + $0x3a0] ss:$16 sps:$4 sm:$0xff]   ;;  %v3243_v28 = vld [vmem:[%s4747_s1 + $0xc8] ss:$16 sps:$4 sm:$0xff]  }
  0x29   : > { %1338 = vmatprep.subr.bf16.mxu0 %v3153_v29  ;;  %v3189_v55 = vld [vmem:[%s4747_s1 + $0x3a4] ss:$16 sps:$4 sm:$0xff]   ;;  %v3194_v60 = vld [vmem:[%s4747_s1 + $0x1c0] ss:$16 sps:$4 sm:$0xff]   ;;  %v3921_v29 = vld [vmem:[%s3757_s25 + $0x68] ss:$16 sps:$4 sm:$0xff]  }
  0x2a   : > { %v3192_v57 = vld [vmem:[%s4747_s1 + $0x1c4] ss:$16 sps:$4 sm:$0xff]   ;;  %v3197_v62 = vld [vmem:[%s4747_s1 + $0x3c0] ss:$16 sps:$4 sm:$0xff]   ;;  %s2874_s9 = sshll.u32 %s3594_s22, 12  ;;  %s4705_s22 = scalar_lea.sflag [#allocation3], %s218_s6 }
  0x2b   : > { %1226 = vmatpush1.bf16.msra.mxu1 %v3152_v30  ;;  %v3195_v59 = vld [vmem:[%s4747_s1 + $0x3c4] ss:$16 sps:$4 sm:$0xff]   ;;  %v3200_v0 = vld [vmem:[%s4747_s1 + $0x1e0] ss:$16 sps:$4 sm:$0xff]   ;;  %s4693_s13 = scalar_lea.hbm %s4751_s5, %s2874_s9 }
  0x2c   : > { %1227 = vmatprep.subr.bf16.mxu1 %v3156_v31  ;;  %1339 = vmatpush1.bf16.msra.mxu0 %v3155_v32  ;;  %v3198_v61 = vld [vmem:[%s4747_s1 + $0x1e4] ss:$16 sps:$4 sm:$0xff]   ;;  %v3206_v2 = vld [vmem:[%s4747_s1 + $0x3e0] ss:$16 sps:$4 sm:$0xff]   ;;  %v3251_v31 = vld [vmem:[%s4747_s1 + $0xec] ss:$16 sps:$4 sm:$0xff]  }
  0x2d   : > { %1340 = vmatprep.subr.bf16.mxu0 %v3159_v33  ;;  %v3201_v63 = vld [vmem:[%s4747_s1 + $0x3e4] ss:$16 sps:$4 sm:$0xff]   ;;  %v3831_v3 = vld [vmem:[%s3757_s25] ss:$16 sps:$4 sm:$0xff]   ;;  %v3930_v32 = vld [vmem:[%s3757_s25 + $0x8c] ss:$16 sps:$4 sm:$0xff]  }
  0x2e   : > { %v3840_v6 = vld [vmem:[%s3757_s25 + $0x24] ss:$16 sps:$4 sm:$0xff]   ;;  %v3859_v11 = vld [vmem:[%s3757_s25 + $0x20] ss:$16 sps:$4 sm:$0xff]   ;;  %v3249_v33 = vld [vmem:[%s4747_s1 + $0xe8] ss:$16 sps:$4 sm:$0xff]  }
  0x2f   : > { %1228 = vmatpush1.bf16.msra.mxu1 %v3158_v34  ;;  %v3868_v14 = vld [vmem:[%s3757_s25 + $0x44] ss:$16 sps:$4 sm:$0xff]   ;;  %v3887_v19 = vld [vmem:[%s3757_s25 + $0x40] ss:$16 sps:$4 sm:$0xff]   ;;  %v3257_v34 = vld [vmem:[%s4747_s1 + $0x10c] ss:$16 sps:$4 sm:$0xff]  }
  0x30   : > { %1229 = vmatprep.subr.bf16.mxu1 %v3162_v35  ;;  %1341 = vmatpush1.bf16.msra.mxu0 %v3161_v36  ;;  %v3896_v22 = vld [vmem:[%s3757_s25 + $0x64] ss:$16 sps:$4 sm:$0xff]   ;;  %v3915_v27 = vld [vmem:[%s3757_s25 + $0x60] ss:$16 sps:$4 sm:$0xff]   ;;  %v3255_v36 = vld [vmem:[%s4747_s1 + $0x108] ss:$16 sps:$4 sm:$0xff]  }
  0x31   : > { %1342 = vmatprep.subr.bf16.mxu0 %v3165_v37  ;;  %v3924_v30 = vld [vmem:[%s3757_s25 + $0x84] ss:$16 sps:$4 sm:$0xff]   ;;  %v3943_v35 = vld [vmem:[%s3757_s25 + $0x80] ss:$16 sps:$4 sm:$0xff]   ;;  %v3949_v37 = vld [vmem:[%s3757_s25 + $0x88] ss:$16 sps:$4 sm:$0xff]  }
  0x33   : > { %1230 = vmatpush1.bf16.msra.mxu1 %v3164_v38  ;;  %v3952_v38 = vld [vmem:[%s3757_s25 + $0xa4] ss:$16 sps:$4 sm:$0xff]  }
  0x34   : > { %1231 = vmatprep.subr.bf16.mxu1 %v3168_v39  ;;  %1343 = vmatpush1.bf16.msra.mxu0 %v3167_v40  ;;  %v3263_v39 = vld [vmem:[%s4747_s1 + $0x12c] ss:$16 sps:$4 sm:$0xff]  }
  0x35   : > { %1344 = vmatprep.subr.bf16.mxu0 %v3171_v41  ;;  %v3958_v40 = vld [vmem:[%s3757_s25 + $0xac] ss:$16 sps:$4 sm:$0xff]   ;;  %v3261_v41 = vld [vmem:[%s4747_s1 + $0x128] ss:$16 sps:$4 sm:$0xff]  }
  0x37   : > { %1232 = vmatpush1.bf16.msra.mxu1 %v3170_v42  ;;  %v3269_v42 = vld [vmem:[%s4747_s1 + $0x14c] ss:$16 sps:$4 sm:$0xff]  }
  0x38   : > { %1233 = vmatprep.subr.bf16.mxu1 %v3174_v43  ;;  %1345 = vmatpush1.bf16.msra.mxu0 %v3173_v44  ;;  %v3971_v43 = vld [vmem:[%s3757_s25 + $0xa0] ss:$16 sps:$4 sm:$0xff]   ;;  %v3267_v44 = vld [vmem:[%s4747_s1 + $0x148] ss:$16 sps:$4 sm:$0xff]  }
  0x39   : > { %1346 = vmatprep.subr.bf16.mxu0 %v3177_v45  ;;  %v3977_v45 = vld [vmem:[%s3757_s25 + $0xa8] ss:$16 sps:$4 sm:$0xff]  }
  0x3b   : > { %1234 = vmatpush1.bf16.msra.mxu1 %v3176_v46  ;;  %v3980_v46 = vld [vmem:[%s3757_s25 + $0xc4] ss:$16 sps:$4 sm:$0xff]  }
  0x3c   : > { %1235 = vmatprep.subr.bf16.mxu1 %v3180_v48  ;;  %1347 = vmatpush1.bf16.msra.mxu0 %v3179_v49  ;;  %v3275_v48 = vld [vmem:[%s4747_s1 + $0x16c] ss:$16 sps:$4 sm:$0xff]  }
  0x3d   : > { %1348 = vmatprep.subr.bf16.mxu0 %v3183_v50  ;;  %v3986_v49 = vld [vmem:[%s3757_s25 + $0xcc] ss:$16 sps:$4 sm:$0xff]   ;;  %v3273_v50 = vld [vmem:[%s4747_s1 + $0x168] ss:$16 sps:$4 sm:$0xff]  }
  0x3f   : > { %1236 = vmatpush1.bf16.msra.mxu1 %v3182_v52  ;;  %v3348_v52 = vld [vmem:[%s4749_s3] ss:$8 sps:$4 sm:$0xff]  }
  0x40   : > { %1237 = vmatprep.subr.bf16.mxu1 %v3186_v53  ;;  %1349 = vmatpush1.bf16.msra.mxu0 %v3185_v54  ;;  %v3350_v53 = vld [vmem:[%s4749_s3 + $0x4] ss:$8 sps:$4 sm:$0xff]   ;;  %v4001_v54 = vld [vmem:[%s3757_s25 + $0xc0] ss:$16 sps:$4 sm:$0xff]  }
  0x41   : > { %1350 = vmatprep.subr.bf16.mxu0 %v3189_v55  ;;  %v3281_v55 = vld [vmem:[%s4747_s1 + $0x18c] ss:$16 sps:$4 sm:$0xff]  }
  0x43   : > { %1238 = vmatpush1.bf16.msra.mxu1 %v3188_v56  ;;  %v3279_v56 = vld [vmem:[%s4747_s1 + $0x188] ss:$16 sps:$4 sm:$0xff]  }
  0x44   : > { %1239 = vmatprep.subr.bf16.mxu1 %v3192_v57  ;;  %1351 = vmatpush1.bf16.msra.mxu0 %v3191_v58  ;;  %v3353_v57 = vld [vmem:[%s4749_s3 + $0x14] ss:$8 sps:$4 sm:$0xff]   ;;  %v4014_v58 = vld [vmem:[%s3757_s25 + $0xc8] ss:$16 sps:$4 sm:$0xff]  }
  0x45   : > { %1352 = vmatprep.subr.bf16.mxu0 %v3195_v59  ;;  %v3351_v59 = vld [vmem:[%s4749_s3 + $0x10] ss:$8 sps:$4 sm:$0xff]  }
  0x47   : > { %1240 = vmatpush1.bf16.msra.mxu1 %v3194_v60  ;;  %v3287_v60 = vld [vmem:[%s4747_s1 + $0x1ac] ss:$16 sps:$4 sm:$0xff]  }
  0x48   : > { %1241 = vmatprep.subr.bf16.mxu1 %v3198_v61  ;;  %1353 = vmatpush1.bf16.msra.mxu0 %v3197_v62  ;;  %v4023_v61 = vld [vmem:[%s3757_s25 + $0xe4] ss:$16 sps:$4 sm:$0xff]   ;;  %v4026_v62 = vld [vmem:[%s3757_s25 + $0xec] ss:$16 sps:$4 sm:$0xff]  }
  0x49   : > { %1354 = vmatprep.subr.bf16.mxu0 %v3201_v63  ;;  %v3285_v63 = vld [vmem:[%s4747_s1 + $0x1a8] ss:$16 sps:$4 sm:$0xff]  }
  0x4b   : > { %1242 = vmatpush1.bf16.msra.mxu1 %v3200_v0  ;;  %v3356_v0 = vld [vmem:[%s4749_s3 + $0x24] ss:$8 sps:$4 sm:$0xff]  }
  0x4c   : > { %1437 = vmatprep.subr.bf16.mxu1 %v3209_v1  ;;  %1355 = vmatpush1.bf16.msra.mxu0 %v3206_v2  ;;  %v3293_v1 = vld [vmem:[%s4747_s1 + $0x1cc] ss:$16 sps:$4 sm:$0xff]   ;;  %v3354_v2 = vld [vmem:[%s4749_s3 + $0x20] ss:$8 sps:$4 sm:$0xff]  }
  0x4d   : > { %2155 = vmatprep.subr.bf16.mxu0 %v3350_v53  ;;  %v3317_v53 = vld [vmem:[%s4747_s1 + $0x2ac] ss:$16 sps:$4 sm:$0xff]  }
  0x4e   : > { %1244 = vmatmul.mubr.bf16.vlgmr.msra.gmra.mrb[0].mxu1 %v3831_v3 }
  0x4f   : > { %1438 = vmatpush1.bf16.msra.mxu1 %v3207_v4  ;;  %1253 = vmatprep.mubr.bf16.mxu1 %v3840_v6  ;;  %v3359_v4 = vld [vmem:[%s4749_s3 + $0x34] ss:$8 sps:$4 sm:$0xff]  }
  0x50   : > { %1357 = vmatmul.mubr.bf16.vlgmr.msra.gmra.mrb[0].mxu0 %v3837_v5  ;;  %1439 = vmatprep.subr.bf16.mxu1 %v3215_v7  ;;  %v4047_v7 = vld [vmem:[%s3757_s25 + $0xe0] ss:$16 sps:$4 sm:$0xff]  }
  0x51   : > { %1366 = vmatprep.mubr.bf16.mxu0 %v3846_v8  ;;  %2156 = vmatpush1.bf16.msra.mxu0 %v3348_v52  ;;  %v3375_v52 = vld [vmem:[%s4749_s3 + $0x90] ss:$8 sps:$4 sm:$0xff]  }
  0x52   : > { %2157 = vmatprep.subr.bf16.mxu0 %v3353_v57  ;;  %v3315_v57 = vld [vmem:[%s4747_s1 + $0x2a8] ss:$16 sps:$4 sm:$0xff]  }
  0x53   : > { %1440 = vmatpush1.bf16.msra.mxu1 %v3213_v9  ;;  %v3357_v9 = vld [vmem:[%s4749_s3 + $0x30] ss:$8 sps:$4 sm:$0xff]  }
  0x54   : > { %1441 = vmatprep.subr.bf16.mxu1 %v3221_v10  ;;  %v3291_v10 = vld [vmem:[%s4747_s1 + $0x1c8] ss:$16 sps:$4 sm:$0xff]  }
  0x55   : > { %2158 = vmatpush1.bf16.msra.mxu0 %v3351_v59  ;;  %v3383_v59 = vld [vmem:[%s4749_s3 + $0xb4] ss:$8 sps:$4 sm:$0xff]  }
  0x56   : > { %1254 = vmatmul.mubr.bf16.gmra.mrb[4].mxu1 %v3859_v11  ;;  %2159 = vmatprep.subr.bf16.mxu0 %v3356_v0  ;;  %v3386_v0 = vld [vmem:[%s4749_s3 + $0xc4] ss:$8 sps:$4 sm:$0xff]  }
  0x57   : > { %1442 = vmatpush1.bf16.msra.mxu1 %v3219_v12  ;;  %1263 = vmatprep.mubr.bf16.mxu1 %v3868_v14  ;;  %v4057_v12 = vld [vmem:[%s3757_s25 + $0xe8] ss:$16 sps:$4 sm:$0xff]  }
  0x58   : > { %1367 = vmatmul.mubr.bf16.gmra.mrb[4].mxu0 %v3865_v13  ;;  %1443 = vmatprep.subr.bf16.mxu1 %v3227_v15  ;;  %v3299_v15 = vld [vmem:[%s4747_s1 + $0x1ec] ss:$16 sps:$4 sm:$0xff]  }
  0x59   : > { %1376 = vmatprep.mubr.bf16.mxu0 %v3874_v16  ;;  %2160 = vmatpush1.bf16.msra.mxu0 %v3354_v2  ;;  %v3321_v2 = vld [vmem:[%s4747_s1 + $0x2e8] ss:$16 sps:$4 sm:$0xff]  }
  0x5a   : > { %2161 = vmatprep.subr.bf16.mxu0 %v3359_v4  ;;  %v3389_v4 = vld [vmem:[%s4749_s3 + $0xd4] ss:$8 sps:$4 sm:$0xff]  }
  0x5b   : > { %1444 = vmatpush1.bf16.msra.mxu1 %v3225_v17  ;;  %v3362_v17 = vld [vmem:[%s4749_s3 + $0x44] ss:$8 sps:$4 sm:$0xff]  }
  0x5c   : > { %1445 = vmatprep.subr.bf16.mxu1 %v3233_v18  ;;  %v3360_v18 = vld [vmem:[%s4749_s3 + $0x40] ss:$8 sps:$4 sm:$0xff]  }
  0x5d   : > { %2162 = vmatpush1.bf16.msra.mxu0 %v3357_v9  ;;  %v3387_v9 = vld [vmem:[%s4749_s3 + $0xd0] ss:$8 sps:$4 sm:$0xff]  }
  0x5e   : > { %1264 = vmatmul.mubr.bf16.gmra.mrb[8].mxu1 %v3887_v19  ;;  %2163 = vmatprep.subr.bf16.mxu0 %v3362_v17  ;;  %v3390_v17 = vld [vmem:[%s4749_s3 + $0xe0] ss:$8 sps:$4 sm:$0xff]  }
  0x5f   : > { %1446 = vmatpush1.bf16.msra.mxu1 %v3231_v20  ;;  %1273 = vmatprep.mubr.bf16.mxu1 %v3896_v22  ;;  %v3297_v20 = vld [vmem:[%s4747_s1 + $0x1e8] ss:$16 sps:$4 sm:$0xff]  }
  0x60   : > { %1377 = vmatmul.mubr.bf16.gmra.mrb[8].mxu0 %v3893_v21  ;;  %1447 = vmatprep.subr.bf16.mxu1 %v3239_v23  ;;  %v3365_v23 = vld [vmem:[%s4749_s3 + $0x54] ss:$8 sps:$4 sm:$0xff]  }
  0x61   : > { %1386 = vmatprep.mubr.bf16.mxu0 %v3902_v24  ;;  %2164 = vmatpush1.bf16.msra.mxu0 %v3360_v18  ;;  %v3327_v18 = vld [vmem:[%s4747_s1 + $0x328] ss:$16 sps:$4 sm:$0xff]  }
  0x62   : > { %2165 = vmatprep.subr.bf16.mxu0 %v3365_v23  ;;  %v3393_v23 = vld [vmem:[%s4749_s3 + $0xf0] ss:$8 sps:$4 sm:$0xff]  }
  0x63   : > { %1448 = vmatpush1.bf16.msra.mxu1 %v3237_v25  ;;  %v3302_v25 = vld [vmem:[%s4747_s1 + $0x20c] ss:$16 sps:$4 sm:$0xff]  }
  0x64   : > { %1449 = vmatprep.subr.bf16.mxu1 %v3245_v26  ;;  %v3300_v26 = vld [vmem:[%s4747_s1 + $0x208] ss:$16 sps:$4 sm:$0xff]  }
  0x66   : > { %1274 = vmatmul.mubr.bf16.gmra.mrb[12].mxu1 %v3915_v27 }
  0x67   : > { %1450 = vmatpush1.bf16.msra.mxu1 %v3243_v28  ;;  %1283 = vmatprep.mubr.bf16.mxu1 %v3924_v30  ;;  %v3305_v28 = vld [vmem:[%s4747_s1 + $0x22c] ss:$16 sps:$4 sm:$0xff]  }
  0x68   : > { %1387 = vmatmul.mubr.bf16.gmra.mrb[12].mxu0 %v3921_v29  ;;  %1451 = vmatprep.subr.bf16.mxu1 %v3251_v31  ;;  %v3368_v31 = vld [vmem:[%s4749_s3 + $0x64] ss:$8 sps:$4 sm:$0xff]  }
  0x69   : > { %1396 = vmatprep.mubr.bf16.mxu0 %v3930_v32 }
  0x6b   : > { %1452 = vmatpush1.bf16.msra.mxu1 %v3249_v33  ;;  %v3366_v33 = vld [vmem:[%s4749_s3 + $0x60] ss:$8 sps:$4 sm:$0xff]  }
  0x6c   : > { %1453 = vmatprep.subr.bf16.mxu1 %v3257_v34  ;;  %v3303_v34 = vld [vmem:[%s4747_s1 + $0x228] ss:$16 sps:$4 sm:$0xff]  }
  0x6e   : > { %1284 = vmatmul.mubr.bf16.gmra.mrb[16].mxu1 %v3943_v35 }
  0x6f   : > { %1454 = vmatpush1.bf16.msra.mxu1 %v3255_v36  ;;  %1293 = vmatprep.mubr.bf16.mxu1 %v3952_v38  ;;  %v3371_v36 = vld [vmem:[%s4749_s3 + $0x74] ss:$8 sps:$4 sm:$0xff]  }
  0x70   : > { %1397 = vmatmul.mubr.bf16.gmra.mrb[16].mxu0 %v3949_v37  ;;  %1455 = vmatprep.subr.bf16.mxu1 %v3263_v39  ;;  %v3308_v39 = vld [vmem:[%s4747_s1 + $0x24c] ss:$16 sps:$4 sm:$0xff]  }
  0x71   : > { %1406 = vmatprep.mubr.bf16.mxu0 %v3958_v40 }
  0x73   : > { %1456 = vmatpush1.bf16.msra.mxu1 %v3261_v41  ;;  %v3369_v41 = vld [vmem:[%s4749_s3 + $0x70] ss:$8 sps:$4 sm:$0xff]  }
  0x74   : > { %1457 = vmatprep.subr.bf16.mxu1 %v3269_v42  ;;  %v3306_v42 = vld [vmem:[%s4747_s1 + $0x248] ss:$16 sps:$4 sm:$0xff]  }
  0x76   : > { %1294 = vmatmul.mubr.bf16.gmra.mrb[20].mxu1 %v3971_v43 }
  0x77   : > { %1458 = vmatpush1.bf16.msra.mxu1 %v3267_v44  ;;  %1303 = vmatprep.mubr.bf16.mxu1 %v3980_v46  ;;  %v3374_v44 = vld [vmem:[%s4749_s3 + $0x84] ss:$8 sps:$4 sm:$0xff]  }
  0x78   : > { %1407 = vmatmul.mubr.bf16.gmra.mrb[20].mxu0 %v3977_v45  ;;  %1459 = vmatprep.subr.bf16.mxu1 %v3275_v48  ;;  %v3309_v48 = vld [vmem:[%s4747_s1 + $0x268] ss:$16 sps:$4 sm:$0xff]  }
  0x79   : > { %1416 = vmatprep.mubr.bf16.mxu0 %v3986_v49 }
  0x7b   : > { %1460 = vmatpush1.bf16.msra.mxu1 %v3273_v50  ;;  %v3377_v50 = vld [vmem:[%s4749_s3 + $0x94] ss:$8 sps:$4 sm:$0xff]  }
  0x7c   : > { %1461 = vmatprep.subr.bf16.mxu1 %v3281_v55  ;;  %v3380_v55 = vld [vmem:[%s4749_s3 + $0xa4] ss:$8 sps:$4 sm:$0xff]  }
  0x7e   : > { %1304 = vmatmul.mubr.bf16.gmra.mrb[24].mxu1 %v4001_v54 }
  0x7f   : > { %1462 = vmatpush1.bf16.msra.mxu1 %v3279_v56  ;;  %1313 = vmatprep.mubr.bf16.mxu1 %v4023_v61  ;;  %v3378_v56 = vld [vmem:[%s4749_s3 + $0xa0] ss:$8 sps:$4 sm:$0xff]  }
  0x80   : > { %1417 = vmatmul.mubr.bf16.gmra.mrb[24].mxu0 %v4014_v58  ;;  %1463 = vmatprep.subr.bf16.mxu1 %v3287_v60  ;;  %v3381_v60 = vld [vmem:[%s4749_s3 + $0xb0] ss:$8 sps:$4 sm:$0xff]  }
  0x81   : > { %1426 = vmatprep.mubr.bf16.mxu0 %v4026_v62 }
  0x83   : > { %1464 = vmatpush1.bf16.msra.mxu1 %v3285_v63  ;;  %v3323_v63 = vld [vmem:[%s4747_s1 + $0x2ec] ss:$16 sps:$4 sm:$0xff]  }
  0x84   : > { %1465 = vmatprep.subr.bf16.mxu1 %v3293_v1  ;;  %v3384_v1 = vld [vmem:[%s4749_s3 + $0xc0] ss:$8 sps:$4 sm:$0xff]  }
  0x86   : > { %1314 = vmatmul.mubr.bf16.gmra.mrb[28].mxu1 %v4047_v7 }
  0x87   : > { %1466 = vmatpush1.bf16.msra.mxu1 %v3291_v10  ;;  %1469 = vmatprep.mubr.bf16.mxu1 %v3769_v47  ;;  %v3363_v47 = vld [vmem:[%s4749_s3 + $0x50] ss:$8 sps:$4 sm:$0xff]   ;;  %v3329_v10 = vld [vmem:[%s4747_s1 + $0x32c] ss:$16 sps:$4 sm:$0xff]  }
  0x88   : > { %1427 = vmatmul.mubr.bf16.gmra.mrb[28].mxu0 %v4057_v12  ;;  %1467 = vmatprep.subr.bf16.mxu1 %v3299_v15  ;;  %v3392_v15 = vld [vmem:[%s4749_s3 + $0xe4] ss:$8 sps:$4 sm:$0xff]  }
  0x89   : > { %2166 = vmatpush1.bf16.msra.mxu0 %v3363_v47  ;;  %v3338_v47 = vld [vmem:[%s4747_s1 + $0x38c] ss:$16 sps:$4 sm:$0xff]  }
  0x8a   : > { %2167 = vmatprep.subr.bf16.mxu0 %v3368_v31  ;;  %v3344_v31 = vld [vmem:[%s4747_s1 + $0x3cc] ss:$16 sps:$4 sm:$0xff]  }
  0x8b   : > { %1468 = vmatpush1.bf16.msra.mxu1 %v3297_v20  ;;  %v3395_v20 = vld [vmem:[%s4749_s3 + $0xf4] ss:$8 sps:$4 sm:$0xff]  }
  0x8c   : > { %1550 = vmatprep.subr.bf16.mxu1 %v3302_v25  ;;  %v3335_v25 = vld [vmem:[%s4747_s1 + $0x36c] ss:$16 sps:$4 sm:$0xff]  }
  0x8d   : > { %2168 = vmatpush1.bf16.msra.mxu0 %v3366_v33  ;;  %v3342_v33 = vld [vmem:[%s4747_s1 + $0x3c8] ss:$16 sps:$4 sm:$0xff]  }
  0x8e   : > { %1470 = vmatmul.mubr.bf16.vlgmr.msra.gmra.mrb[32].mxu1 %v3831_v3  ;;  %v3311_v3 = vld [vmem:[%s4747_s1 + $0x26c] ss:$16 sps:$4 sm:$0xff]   ;;  %2169 = vmatprep.subr.bf16.mxu0 %v3371_v36 }
  0x8f   : > { %1551 = vmatpush1.bf16.msra.mxu1 %v3300_v26  ;;  %1479 = vmatprep.mubr.bf16.mxu1 %v3840_v6  ;;  %v3372_v6 = vld [vmem:[%s4749_s3 + $0x80] ss:$8 sps:$4 sm:$0xff]  }
  0x90   : > { %1552 = vmatprep.subr.bf16.mxu1 %v3305_v28  ;;  %v3333_v26 = vld [vmem:[%s4747_s1 + $0x368] ss:$16 sps:$4 sm:$0xff]  }
  0x91   : > { %2170 = vmatpush1.bf16.msra.mxu0 %v3369_v41  ;;  %v3336_v28 = vld [vmem:[%s4747_s1 + $0x388] ss:$16 sps:$4 sm:$0xff]  }
  0x92   : > { %2171 = vmatprep.subr.bf16.mxu0 %v3374_v44 }
  0x93   : > { %1553 = vmatpush1.bf16.msra.mxu1 %v3303_v34 }
  0x94   : > { %1554 = vmatprep.subr.bf16.mxu1 %v3308_v39 }
  0x95   : > { %2172 = vmatpush1.bf16.msra.mxu0 %v3372_v6 }
  0x96   : > { %1480 = vmatmul.mubr.bf16.gmra.mrb[36].mxu1 %v3859_v11  ;;  %v3314_v11 = vld [vmem:[%s4747_s1 + $0x28c] ss:$16 sps:$4 sm:$0xff]   ;;  %2173 = vmatprep.subr.bf16.mxu0 %v3377_v50 }
  0x97   : > { %1555 = vmatpush1.bf16.msra.mxu1 %v3306_v42  ;;  %1489 = vmatprep.mubr.bf16.mxu1 %v3868_v14  ;;  %v3312_v14 = vld [vmem:[%s4747_s1 + $0x288] ss:$16 sps:$4 sm:$0xff]  }
  0x98   : > { %1556 = vmatprep.subr.bf16.mxu1 %v3311_v3 }
  0x99   : > { %2174 = vmatpush1.bf16.msra.mxu0 %v3375_v52 }
  0x9a   : > { %2175 = vmatprep.subr.bf16.mxu0 %v3380_v55 }
  0x9b   : > { %1557 = vmatpush1.bf16.msra.mxu1 %v3309_v48 }
  0x9c   : > { %1558 = vmatprep.subr.bf16.mxu1 %v3314_v11 }
  0x9d   : > { %2176 = vmatpush1.bf16.msra.mxu0 %v3378_v56 }
  0x9e   : > { %1490 = vmatmul.mubr.bf16.gmra.mrb[40].mxu1 %v3887_v19  ;;  %v3320_v19 = vld [vmem:[%s4747_s1 + $0x2cc] ss:$16 sps:$4 sm:$0xff]   ;;  %2177 = vmatprep.subr.bf16.mxu0 %v3383_v59 }
  0x9f   : > { %1559 = vmatpush1.bf16.msra.mxu1 %v3312_v14  ;;  %1499 = vmatprep.mubr.bf16.mxu1 %v3896_v22  ;;  %v3318_v22 = vld [vmem:[%s4747_s1 + $0x2c8] ss:$16 sps:$4 sm:$0xff]  }
  0xa0   : > { %1560 = vmatprep.subr.bf16.mxu1 %v3317_v53 }
  0xa1   : > { %2178 = vmatpush1.bf16.msra.mxu0 %v3381_v60  ;;  %v3396_v60 = vld [vmem:[%s4749_s3 + $0x100] ss:$8 sps:$4 sm:$0xff]  }
  0xa2   : > { %2179 = vmatprep.subr.bf16.mxu0 %v3386_v0 }
  0xa3   : > { %1561 = vmatpush1.bf16.msra.mxu1 %v3315_v57 }
  0xa4   : > { %1562 = vmatprep.subr.bf16.mxu1 %v3320_v19 }
  0xa5   : > { %2180 = vmatpush1.bf16.msra.mxu0 %v3384_v1 }
  0xa6   : > { %1500 = vmatmul.mubr.bf16.gmra.mrb[44].mxu1 %v3915_v27  ;;  %v3326_v27 = vld [vmem:[%s4747_s1 + $0x30c] ss:$16 sps:$4 sm:$0xff]   ;;  %2181 = vmatprep.subr.bf16.mxu0 %v3389_v4 }
  0xa7   : > { %1563 = vmatpush1.bf16.msra.mxu1 %v3318_v22  ;;  %1509 = vmatprep.mubr.bf16.mxu1 %v3924_v30  ;;  %v3324_v30 = vld [vmem:[%s4747_s1 + $0x308] ss:$16 sps:$4 sm:$0xff]  }
  0xa8   : > { %1564 = vmatprep.subr.bf16.mxu1 %v3323_v63 }
  0xa9   : > { %2182 = vmatpush1.bf16.msra.mxu0 %v3387_v9 }
  0xaa   : > { %2183 = vmatprep.subr.bf16.mxu0 %v3392_v15 }
  0xab   : > { %1565 = vmatpush1.bf16.msra.mxu1 %v3321_v2  ;;  %v3401_v2 = vld [vmem:[%s4749_s3 + $0x114] ss:$8 sps:$4 sm:$0xff]  }
  0xac   : > { %1566 = vmatprep.subr.bf16.mxu1 %v3326_v27 }
  0xad   : > { %2184 = vmatpush1.bf16.msra.mxu0 %v3390_v17  ;;  %v3399_v17 = vld [vmem:[%s4749_s3 + $0x110] ss:$8 sps:$4 sm:$0xff]  }
  0xae   : > { %1510 = vmatmul.mubr.bf16.gmra.mrb[48].mxu1 %v3943_v35  ;;  %v3332_v35 = vld [vmem:[%s4747_s1 + $0x34c] ss:$16 sps:$4 sm:$0xff]   ;;  %2185 = vmatprep.subr.bf16.mxu0 %v3395_v20 }
  0xaf   : > { %1567 = vmatpush1.bf16.msra.mxu1 %v3324_v30  ;;  %1519 = vmatprep.mubr.bf16.mxu1 %v3952_v38  ;;  %v3330_v38 = vld [vmem:[%s4747_s1 + $0x348] ss:$16 sps:$4 sm:$0xff]  }
  0xb0   : > { %1568 = vmatprep.subr.bf16.mxu1 %v3329_v10 }
  0xb1   : > { %2186 = vmatpush1.bf16.msra.mxu0 %v3393_v23 }
  0xb3   : > { %1569 = vmatpush1.bf16.msra.mxu1 %v3327_v18 }
  0xb4   : > { %1570 = vmatprep.subr.bf16.mxu1 %v3332_v35  ;;  %v3404_v35 = vld [vmem:[%s4749_s3 + $0x124] ss:$8 sps:$4 sm:$0xff]  }
  0xb6   : > { %1520 = vmatmul.mubr.bf16.gmra.mrb[52].mxu1 %v3971_v43  ;;  %v3341_v43 = vld [vmem:[%s4747_s1 + $0x3ac] ss:$16 sps:$4 sm:$0xff]  }
  0xb7   : > { %1571 = vmatpush1.bf16.msra.mxu1 %v3330_v38  ;;  %1529 = vmatprep.mubr.bf16.mxu1 %v3980_v46  ;;  %v3339_v46 = vld [vmem:[%s4747_s1 + $0x3a8] ss:$16 sps:$4 sm:$0xff]  }
  0xb8   : > { %1572 = vmatprep.subr.bf16.mxu1 %v3335_v25 }
  0xbb   : > { %1573 = vmatpush1.bf16.msra.mxu1 %v3333_v26 }
  0xbc   : > { %1574 = vmatprep.subr.bf16.mxu1 %v3338_v47 }
  0xbe   : > { %1530 = vmatmul.mubr.bf16.gmra.mrb[56].mxu1 %v4001_v54  ;;  %v3347_v54 = vld [vmem:[%s4747_s1 + $0x3ec] ss:$16 sps:$4 sm:$0xff]  }
  0xbf   : > { %1575 = vmatpush1.bf16.msra.mxu1 %v3336_v28  ;;  %1539 = vmatprep.mubr.bf16.mxu1 %v4023_v61  ;;  %v3345_v61 = vld [vmem:[%s4747_s1 + $0x3e8] ss:$16 sps:$4 sm:$0xff]  }
  0xc0   : > { %1576 = vmatprep.subr.bf16.mxu1 %v3341_v43 }
  0xc3   : > { %1577 = vmatpush1.bf16.msra.mxu1 %v3339_v46 }
  0xc4   : > { %1578 = vmatprep.subr.bf16.mxu1 %v3344_v31 }
  0xc6   : > { %1540 = vmatmul.mubr.bf16.gmra.mrb[60].mxu1 %v4047_v7 }
  0xc7   : > { %1579 = vmatpush1.bf16.msra.mxu1 %v3342_v33  ;;  %1582 = vmatprep.mubr.bf16.mxu1 %v3782_v51  ;;  %v3398_v51 = vld [vmem:[%s4749_s3 + $0x104] ss:$8 sps:$4 sm:$0xff]  }
  0xc8   : > { %1580 = vmatprep.subr.bf16.mxu1 %v3347_v54  ;;  %2268 = vmatprep.subr.bf16.mxu0 %v3398_v51  ;;  %v3402_v54 = vld [vmem:[%s4749_s3 + $0x120] ss:$8 sps:$4 sm:$0xff]  }
  0xcb   : > { %1581 = vmatpush1.bf16.msra.mxu1 %v3345_v61 }
  0xce   : > { %1583 = vmatmul.mubr.bf16.vlgmr.msra.gmra.mrb[32].mxu1 %v3837_v5  ;;  %v391_v5 = vlaneseq }
  0xcf   : > { %1592 = vmatprep.mubr.bf16.mxu1 %v3846_v8 }
  0xd0   : > { %v4270_v8 = vshrl.u32 %v391_v5, 7 }
  0xd6   : > { %1593 = vmatmul.mubr.bf16.gmra.mrb[36].mxu1 %v3865_v13  ;;  %v393_v13 = vsub.s32 0, %v4270_v8 }
  0xd7   : > { %1602 = vmatprep.mubr.bf16.mxu1 %v3874_v16  ;;  %v4276_v16 = vld [vmem:[%s4748_s2] sm:$0xf] }
  0xde   : > { %1603 = vmatmul.mubr.bf16.gmra.mrb[40].mxu1 %v3893_v21  ;;  %v397_v21 = vsub.s32 1, %v4270_v8 }
  0xdf   : > { %1612 = vmatprep.mubr.bf16.mxu1 %v3902_v24  ;;  %v4282_v24 = vrot.slane %v4276_v16, %v393_v13 }
  0xe6   : > { %1613 = vmatmul.mubr.bf16.gmra.mrb[44].mxu1 %v3921_v29  ;;  %v4287_v29 = vrot.slane %v4276_v16, %v397_v21 }
  0xe7   : > { %1622 = vmatprep.mubr.bf16.mxu1 %v3930_v32 }
  0xee   : > { %1623 = vmatmul.mubr.bf16.gmra.mrb[48].mxu1 %v3949_v37 }
  0xef   : > { %1632 = vmatprep.mubr.bf16.mxu1 %v3958_v40 }
  0xf6   : > { %1633 = vmatmul.mubr.bf16.gmra.mrb[52].mxu1 %v3977_v45 }
  0xf7   : > { %1642 = vmatprep.mubr.bf16.mxu1 %v3986_v49 }
  0xfe   : > { %1643 = vmatmul.mubr.bf16.gmra.mrb[56].mxu1 %v4014_v58 }
  0xff   : > { %1652 = vmatprep.mubr.bf16.mxu1 %v4026_v62 }
 0x106   : > { %1653 = vmatmul.mubr.bf16.gmra.mrb[60].mxu1 %v4057_v12 }
 0x121   : > { %v1245_v32 = vpop.f32.mrb[0].mxu1 }
 0x122   : > { %v1246_v37 = vadd.f32 %v1245_v32, %v4282_v24  ;;  %v1247_v40 = vpop.f32.mrb[1].mxu1 }
 0x123   : > { %v1248_v45 = vadd.f32 %v1247_v40, %v4287_v29  ;;  %v1249_v49 = vpop.f32.mrb[2].mxu1  ;;  %v1358_v58 = vpop.f32.mrb[0].mxu0 }
 0x124   : > { %v1250_v62 = vadd.f32 %v1249_v49, %v4282_v24  ;;  %v1359_v7 = vadd.f32 %v1358_v58, %v1246_v37  ;;  %v1251_v12 = vpop.f32.mrb[3].mxu1  ;;  %v1360_v34 = vpop.f32.mrb[1].mxu0  ;;  %v3407_v37 = vld [vmem:[%s4749_s3 + $0x134] ss:$8 sps:$4 sm:$0xff]  }
 0x125   : > { %v1252_v36 = vadd.f32 %v1251_v12, %v4287_v29  ;;  %v1361_v39 = vadd.f32 %v1360_v34, %v1248_v45  ;;  %v1362_v41 = vpop.f32.mrb[2].mxu0  ;;  %v3405_v12 = vld [vmem:[%s4749_s3 + $0x130] ss:$8 sps:$4 sm:$0xff]  }
 0x126   : > { %v1363_v42 = vadd.f32 %v1362_v41, %v1250_v62  ;;  %v1364_v3 = vpop.f32.mrb[3].mxu0  ;;  %v1663_v6 = vmax.f32 %v1359_v7, 0.0 }
 0x127   : > { %v1365_v44 = vadd.f32 %v1364_v3, %v1252_v36  ;;  %v1664_v50 = vmax.f32 %v1361_v39, 0.0  ;;  %v3410_v39 = vld [vmem:[%s4749_s3 + $0x144] ss:$8 sps:$4 sm:$0xff]  }
 0x128   : > { %v1667_v48 = vmax.f32 %v1363_v42, 0.0 }
 0x129   : > { %v1668_v11 = vmax.f32 %v1365_v44, 0.0  ;;  %v1255_v52 = vpop.f32.mrb[4].mxu1 }
 0x12a   : > { %v1727_v14 = vpack.c.bf16 %v1667_v48, %v1663_v6  ;;  %v1256_v53 = vadd.f32 %v1255_v52, %v4282_v24  ;;  %v1257_v55 = vpop.f32.mrb[5].mxu1 }
 0x12b   : > { %v1728_v56 = vpack.c.bf16 %v1668_v11, %v1664_v50  ;;  %v1258_v57 = vadd.f32 %v1257_v55, %v4287_v29  ;;  %v1259_v59 = vpop.f32.mrb[6].mxu1  ;;  %v1368_v19 = vpop.f32.mrb[4].mxu0 }
 0x12c   : > { %v1260_v22 = vadd.f32 %v1259_v59, %v4282_v24  ;;  %v1369_v63 = vadd.f32 %v1368_v19, %v1256_v53  ;;  %v1261_v0 = vpop.f32.mrb[7].mxu1  ;;  %v1370_v1 = vpop.f32.mrb[5].mxu0  ;;  %v3408_v53 = vld [vmem:[%s4749_s3 + $0x140] ss:$8 sps:$4 sm:$0xff]   ;;  %v3413_v19 = vld [vmem:[%s4749_s3 + $0x154] ss:$8 sps:$4 sm:$0xff]  }
 0x12d   : > { %v1262_v4 = vadd.f32 %v1261_v0, %v4287_v29  ;;  %v1371_v27 = vadd.f32 %v1370_v1, %v1258_v57  ;;  %v1372_v9 = vpop.f32.mrb[6].mxu0  ;;  %2187 = vmatprep.mubr.bf16.mxu0 %v1728_v56 }
 0x12e   : > { %v1373_v30 = vadd.f32 %v1372_v9, %v1260_v22  ;;  %v1374_v10 = vpop.f32.mrb[7].mxu0  ;;  %2188 = vmatmul.mubr.bf16.vlgmr.msra.gmra.mrb[32].mxu0 %v1727_v14  ;;  %v1671_v18 = vmax.f32 %v1369_v63, 0.0 }
 0x12f   : > { %v1375_v15 = vadd.f32 %v1374_v10, %v1262_v4  ;;  %2269 = vmatpush1.bf16.msra.mxu0 %v3396_v60  ;;  %v1672_v23 = vmax.f32 %v1371_v27, 0.0  ;;  %v3411_v4 = vld [vmem:[%s4749_s3 + $0x150] ss:$8 sps:$4 sm:$0xff]  }
 0x130   : > { %v1675_v20 = vmax.f32 %v1373_v30, 0.0  ;;  %2270 = vmatprep.subr.bf16.mxu0 %v3401_v2  ;;  %v3416_v30 = vld [vmem:[%s4749_s3 + $0x164] ss:$8 sps:$4 sm:$0xff]  }
 0x131   : > { %v1676_v38 = vmax.f32 %v1375_v15, 0.0  ;;  %v1265_v25 = vpop.f32.mrb[8].mxu1 }
 0x132   : > { %v1731_v26 = vpack.c.bf16 %v1675_v20, %v1671_v18  ;;  %v1266_v47 = vadd.f32 %v1265_v25, %v4282_v24  ;;  %v1267_v28 = vpop.f32.mrb[9].mxu1 }
 0x133   : > { %v1732_v43 = vpack.c.bf16 %v1676_v38, %v1672_v23  ;;  %v1268_v46 = vadd.f32 %v1267_v28, %v4287_v29  ;;  %v1269_v31 = vpop.f32.mrb[10].mxu1  ;;  %v1378_v33 = vpop.f32.mrb[8].mxu0  ;;  %2271 = vmatpush1.bf16.msra.mxu0 %v3399_v17 }
 0x134   : > { %v1270_v61 = vadd.f32 %v1269_v31, %v4282_v24  ;;  %v1379_v51 = vadd.f32 %v1378_v33, %v1266_v47  ;;  %v1271_v5 = vpop.f32.mrb[11].mxu1  ;;  %v1380_v32 = vpop.f32.mrb[9].mxu0  ;;  %2272 = vmatprep.subr.bf16.mxu0 %v3404_v35  ;;  %v3414_v47 = vld [vmem:[%s4749_s3 + $0x160] ss:$8 sps:$4 sm:$0xff]   ;;  %v3419_v33 = vld [vmem:[%s4749_s3 + $0x174] ss:$8 sps:$4 sm:$0xff]  }
 0x135   : > { %v1272_v40 = vadd.f32 %v1271_v5, %v4287_v29  ;;  %v1381_v45 = vadd.f32 %v1380_v32, %v1268_v46  ;;  %v1382_v49 = vpop.f32.mrb[10].mxu0  ;;  %2197 = vmatprep.mubr.bf16.mxu0 %v1732_v43 }
 0x136   : > { %v1383_v58 = vadd.f32 %v1382_v49, %v1270_v61  ;;  %v1384_v62 = vpop.f32.mrb[11].mxu0  ;;  %2198 = vmatmul.mubr.bf16.gmra.mrb[36].mxu0 %v1731_v26  ;;  %v1679_v34 = vmax.f32 %v1379_v51, 0.0 }
 0x137   : > { %v1385_v7 = vadd.f32 %v1384_v62, %v1272_v40  ;;  %2273 = vmatpush1.bf16.msra.mxu0 %v3402_v54  ;;  %v1680_v41 = vmax.f32 %v1381_v45, 0.0  ;;  %v3417_v40 = vld [vmem:[%s4749_s3 + $0x170] ss:$8 sps:$4 sm:$0xff]  }
 0x138   : > { %v1683_v36 = vmax.f32 %v1383_v58, 0.0  ;;  %2274 = vmatprep.subr.bf16.mxu0 %v3407_v37  ;;  %v3422_v58 = vld [vmem:[%s4749_s3 + $0x184] ss:$8 sps:$4 sm:$0xff]  }
 0x139   : > { %v1684_v42 = vmax.f32 %v1385_v7, 0.0  ;;  %v1275_v3 = vpop.f32.mrb[12].mxu1 }
 0x13a   : > { %v1735_v44 = vpack.c.bf16 %v1683_v36, %v1679_v34  ;;  %v1276_v6 = vadd.f32 %v1275_v3, %v4282_v24  ;;  %v1277_v48 = vpop.f32.mrb[13].mxu1 }
 0x13b   : > { %v1736_v50 = vpack.c.bf16 %v1684_v42, %v1680_v41  ;;  %v1278_v11 = vadd.f32 %v1277_v48, %v4287_v29  ;;  %v1279_v52 = vpop.f32.mrb[14].mxu1  ;;  %v1388_v14 = vpop.f32.mrb[12].mxu0  ;;  %2275 = vmatpush1.bf16.msra.mxu0 %v3405_v12 }
 0x13c   : > { %v1280_v55 = vadd.f32 %v1279_v52, %v4282_v24  ;;  %v1389_v56 = vadd.f32 %v1388_v14, %v1276_v6  ;;  %v1281_v57 = vpop.f32.mrb[15].mxu1  ;;  %v1390_v59 = vpop.f32.mrb[13].mxu0  ;;  %2276 = vmatprep.subr.bf16.mxu0 %v3410_v39  ;;  %v3420_v6 = vld [vmem:[%s4749_s3 + $0x180] ss:$8 sps:$4 sm:$0xff]   ;;  %v3425_v14 = vld [vmem:[%s4749_s3 + $0x194] ss:$8 sps:$4 sm:$0xff]  }
 0x13d   : > { %v1282_v60 = vadd.f32 %v1281_v57, %v4287_v29  ;;  %v1391_v22 = vadd.f32 %v1390_v59, %v1278_v11  ;;  %v1392_v63 = vpop.f32.mrb[14].mxu0  ;;  %2207 = vmatprep.mubr.bf16.mxu0 %v1736_v50 }
 0x13e   : > { %v1393_v0 = vadd.f32 %v1392_v63, %v1280_v55  ;;  %v1394_v1 = vpop.f32.mrb[15].mxu0  ;;  %2208 = vmatmul.mubr.bf16.gmra.mrb[40].mxu0 %v1735_v44  ;;  %v1687_v27 = vmax.f32 %v1389_v56, 0.0 }
 0x13f   : > { %v1395_v2 = vadd.f32 %v1394_v1, %v1282_v60  ;;  %2277 = vmatpush1.bf16.msra.mxu0 %v3408_v53  ;;  %v1688_v10 = vmax.f32 %v1391_v22, 0.0  ;;  %v3423_v60 = vld [vmem:[%s4749_s3 + $0x190] ss:$8 sps:$4 sm:$0xff]  }
 0x140   : > { %v1691_v9 = vmax.f32 %v1393_v0, 0.0  ;;  %2278 = vmatprep.subr.bf16.mxu0 %v3413_v19  ;;  %v3428_v0 = vld [vmem:[%s4749_s3 + $0x1a4] ss:$8 sps:$4 sm:$0xff]  }
 0x141   : > { %v1692_v15 = vmax.f32 %v1395_v2, 0.0  ;;  %v1285_v17 = vpop.f32.mrb[16].mxu1 }
 0x142   : > { %v1739_v18 = vpack.c.bf16 %v1691_v9, %v1687_v27  ;;  %v1286_v20 = vadd.f32 %v1285_v17, %v4282_v24  ;;  %v1287_v35 = vpop.f32.mrb[17].mxu1 }
 0x143   : > { %v1740_v23 = vpack.c.bf16 %v1692_v15, %v1688_v10  ;;  %v1288_v38 = vadd.f32 %v1287_v35, %v4287_v29  ;;  %v1289_v25 = vpop.f32.mrb[18].mxu1  ;;  %v1398_v26 = vpop.f32.mrb[16].mxu0  ;;  %2279 = vmatpush1.bf16.msra.mxu0 %v3411_v4 }
 0x144   : > { %v1290_v28 = vadd.f32 %v1289_v25, %v4282_v24  ;;  %v1399_v43 = vadd.f32 %v1398_v26, %v1286_v20  ;;  %v1291_v46 = vpop.f32.mrb[19].mxu1  ;;  %v1400_v31 = vpop.f32.mrb[17].mxu0  ;;  %2280 = vmatprep.subr.bf16.mxu0 %v3416_v30  ;;  %v3426_v20 = vld [vmem:[%s4749_s3 + $0x1a0] ss:$8 sps:$4 sm:$0xff]   ;;  %v3431_v26 = vld [vmem:[%s4749_s3 + $0x1b4] ss:$8 sps:$4 sm:$0xff]  }
 0x145   : > { %v1292_v54 = vadd.f32 %v1291_v46, %v4287_v29  ;;  %v1401_v61 = vadd.f32 %v1400_v31, %v1288_v38  ;;  %v1402_v51 = vpop.f32.mrb[18].mxu0  ;;  %2217 = vmatprep.mubr.bf16.mxu0 %v1740_v23 }
 0x146   : > { %v1403_v5 = vadd.f32 %v1402_v51, %v1290_v28  ;;  %v1404_v32 = vpop.f32.mrb[19].mxu0  ;;  %2218 = vmatmul.mubr.bf16.gmra.mrb[44].mxu0 %v1739_v18  ;;  %v1695_v45 = vmax.f32 %v1399_v43, 0.0 }
 0x147   : > { %v1405_v37 = vadd.f32 %v1404_v32, %v1292_v54  ;;  %2281 = vmatpush1.bf16.msra.mxu0 %v3414_v47  ;;  %v1696_v62 = vmax.f32 %v1401_v61, 0.0  ;;  %v3429_v54 = vld [vmem:[%s4749_s3 + $0x1b0] ss:$8 sps:$4 sm:$0xff]  }
 0x148   : > { %v1699_v49 = vmax.f32 %v1403_v5, 0.0  ;;  %2282 = vmatprep.subr.bf16.mxu0 %v3419_v33  ;;  %v3434_v5 = vld [vmem:[%s4749_s3 + $0x1c4] ss:$8 sps:$4 sm:$0xff]  }
 0x149   : > { %v1700_v7 = vmax.f32 %v1405_v37, 0.0  ;;  %v1295_v12 = vpop.f32.mrb[20].mxu1 }
 0x14a   : > { %v1743_v34 = vpack.c.bf16 %v1699_v49, %v1695_v45  ;;  %v1296_v36 = vadd.f32 %v1295_v12, %v4282_v24  ;;  %v1297_v39 = vpop.f32.mrb[21].mxu1 }
 0x14b   : > { %v1744_v41 = vpack.c.bf16 %v1700_v7, %v1696_v62  ;;  %v1298_v42 = vadd.f32 %v1297_v39, %v4287_v29  ;;  %v1299_v3 = vpop.f32.mrb[22].mxu1  ;;  %v1408_v44 = vpop.f32.mrb[20].mxu0  ;;  %2283 = vmatpush1.bf16.msra.mxu0 %v3417_v40 }
 0x14c   : > { %v1300_v48 = vadd.f32 %v1299_v3, %v4282_v24  ;;  %v1409_v50 = vadd.f32 %v1408_v44, %v1296_v36  ;;  %v1301_v11 = vpop.f32.mrb[23].mxu1  ;;  %v1410_v52 = vpop.f32.mrb[21].mxu0  ;;  %2284 = vmatprep.subr.bf16.mxu0 %v3422_v58  ;;  %v3432_v36 = vld [vmem:[%s4749_s3 + $0x1c0] ss:$8 sps:$4 sm:$0xff]   ;;  %v3437_v44 = vld [vmem:[%s4749_s3 + $0x1d4] ss:$8 sps:$4 sm:$0xff]  }
 0x14d   : > { %v1302_v53 = vadd.f32 %v1301_v11, %v4287_v29  ;;  %v1411_v55 = vadd.f32 %v1410_v52, %v1298_v42  ;;  %v1412_v56 = vpop.f32.mrb[22].mxu0  ;;  %2227 = vmatprep.mubr.bf16.mxu0 %v1744_v41 }
 0x14e   : > { %v1413_v57 = vadd.f32 %v1412_v56, %v1300_v48  ;;  %v1414_v59 = vpop.f32.mrb[23].mxu0  ;;  %2228 = vmatmul.mubr.bf16.gmra.mrb[48].mxu0 %v1743_v34  ;;  %v1703_v22 = vmax.f32 %v1409_v50, 0.0  ;;  %v3440_v56 = vld [vmem:[%s4749_s3 + $0x1e4] ss:$8 sps:$4 sm:$0xff]  }
 0x14f   : > { %v1415_v19 = vadd.f32 %v1414_v59, %v1302_v53  ;;  %2285 = vmatpush1.bf16.msra.mxu0 %v3420_v6  ;;  %v1704_v1 = vmax.f32 %v1411_v55, 0.0 }
 0x150   : > { %v1707_v63 = vmax.f32 %v1413_v57, 0.0  ;;  %2286 = vmatprep.subr.bf16.mxu0 %v3425_v14 }
 0x151   : > { %v1708_v2 = vmax.f32 %v1415_v19, 0.0  ;;  %v1305_v4 = vpop.f32.mrb[24].mxu1 }
 0x152   : > { %v1747_v27 = vpack.c.bf16 %v1707_v63, %v1703_v22  ;;  %v1306_v9 = vadd.f32 %v1305_v4, %v4282_v24  ;;  %v1307_v30 = vpop.f32.mrb[25].mxu1  ;;  %v3443_v22 = vld [vmem:[%s4749_s3 + $0x1f4] ss:$8 sps:$4 sm:$0xff]   ;;  %v3441_v63 = vld [vmem:[%s4749_s3 + $0x1f0] ss:$8 sps:$4 sm:$0xff]  }
 0x153   : > { %v1748_v10 = vpack.c.bf16 %v1708_v2, %v1704_v1  ;;  %v1308_v15 = vadd.f32 %v1307_v30, %v4287_v29  ;;  %v1309_v17 = vpop.f32.mrb[26].mxu1  ;;  %v1418_v18 = vpop.f32.mrb[24].mxu0  ;;  %2287 = vmatpush1.bf16.msra.mxu0 %v3423_v60  ;;  %v3438_v60 = vld [vmem:[%s4749_s3 + $0x1e0] ss:$8 sps:$4 sm:$0xff]   ;;  %v405_v1 = vsub.s32 3, %v4270_v8 }
 0x154   : > { %v1310_v35 = vadd.f32 %v1309_v17, %v4282_v24  ;;  %v1419_v23 = vadd.f32 %v1418_v18, %v1306_v9  ;;  %v1311_v38 = vpop.f32.mrb[27].mxu1  ;;  %v1420_v25 = vpop.f32.mrb[25].mxu0  ;;  %2288 = vmatprep.subr.bf16.mxu0 %v3428_v0  ;;  %v401_v0 = vsub.s32 2, %v4270_v8 }
 0x155   : > { %v1312_v47 = vadd.f32 %v1311_v38, %v4287_v29  ;;  %v1421_v28 = vadd.f32 %v1420_v25, %v1308_v15  ;;  %v1422_v43 = vpop.f32.mrb[26].mxu0  ;;  %2237 = vmatprep.mubr.bf16.mxu0 %v1748_v10  ;;  %v4420_v4 = vrot.slane %v4276_v16, %v405_v1 }
 0x156   : > { %v1423_v46 = vadd.f32 %v1422_v43, %v1310_v35  ;;  %v1424_v31 = vpop.f32.mrb[27].mxu0  ;;  %2238 = vmatmul.mubr.bf16.gmra.mrb[52].mxu0 %v1747_v27  ;;  %v1711_v61 = vmax.f32 %v1419_v23, 0.0  ;;  %v4417_v2 = vrot.slane %v4276_v16, %v401_v0 }
 0x157   : > { %v1425_v33 = vadd.f32 %v1424_v31, %v1312_v47  ;;  %2289 = vmatpush1.bf16.msra.mxu0 %v3426_v20  ;;  %v1712_v32 = vmax.f32 %v1421_v28, 0.0 }
 0x158   : > { %v1715_v51 = vmax.f32 %v1423_v46, 0.0  ;;  %2290 = vmatprep.subr.bf16.mxu0 %v3431_v26 }
 0x159   : > { %v1716_v37 = vmax.f32 %v1425_v33, 0.0  ;;  %v1315_v40 = vpop.f32.mrb[28].mxu1 }
 0x15a   : > { %v1751_v45 = vpack.c.bf16 %v1715_v51, %v1711_v61  ;;  %v1316_v49 = vadd.f32 %v1315_v40, %v4282_v24  ;;  %v1317_v58 = vpop.f32.mrb[29].mxu1 }
 0x15b   : > { %v1752_v62 = vpack.c.bf16 %v1716_v37, %v1712_v32  ;;  %v1318_v7 = vadd.f32 %v1317_v58, %v4287_v29  ;;  %v1319_v12 = vpop.f32.mrb[30].mxu1  ;;  %v1428_v34 = vpop.f32.mrb[28].mxu0  ;;  %2291 = vmatpush1.bf16.msra.mxu0 %v3429_v54 }
 0x15c   : > { %v1320_v39 = vadd.f32 %v1319_v12, %v4282_v24  ;;  %v1429_v41 = vadd.f32 %v1428_v34, %v1316_v49  ;;  %v1321_v42 = vpop.f32.mrb[31].mxu1  ;;  %v1430_v3 = vpop.f32.mrb[29].mxu0  ;;  %2292 = vmatprep.subr.bf16.mxu0 %v3434_v5  ;;  %v3435_v24 = vld [vmem:[%s4749_s3 + $0x1d0] ss:$8 sps:$4 sm:$0xff]  }
 0x15d   : > { %v1322_v6 = vadd.f32 %v1321_v42, %v4287_v29  ;;  %v1431_v48 = vadd.f32 %v1430_v3, %v1318_v7  ;;  %v1432_v50 = vpop.f32.mrb[30].mxu0  ;;  %2247 = vmatprep.mubr.bf16.mxu0 %v1752_v62 }
 0x15e   : > { %v1433_v11 = vadd.f32 %v1432_v50, %v1320_v39  ;;  %v1434_v52 = vpop.f32.mrb[31].mxu0  ;;  %2248 = vmatmul.mubr.bf16.gmra.mrb[56].mxu0 %v1751_v45  ;;  %v1719_v53 = vmax.f32 %v1429_v41, 0.0 }
 0x15f   : > { %v1435_v14 = vadd.f32 %v1434_v52, %v1322_v6  ;;  %2293 = vmatpush1.bf16.msra.mxu0 %v3432_v36  ;;  %v1720_v29 = vmax.f32 %v1431_v48, 0.0 }
 0x160   : > { %v1723_v55 = vmax.f32 %v1433_v11, 0.0  ;;  %2294 = vmatprep.subr.bf16.mxu0 %v3437_v44 }
 0x161   : > { %v1724_v57 = vmax.f32 %v1435_v14, 0.0 }
 0x162   : > { %v1755_v59 = vpack.c.bf16 %v1723_v55, %v1719_v53 }
 0x163   : > { %v1756_v19 = vpack.c.bf16 %v1724_v57, %v1720_v29  ;;  %2295 = vmatpush1.bf16.msra.mxu0 %v3435_v24 }
 0x164   : > { %2296 = vmatprep.subr.bf16.mxu0 %v3440_v56 }
 0x165   : > { %2257 = vmatprep.mubr.bf16.mxu0 %v1756_v19 }
 0x166   : > { %2258 = vmatmul.mubr.bf16.gmra.mrb[60].mxu0 %v1755_v59 }
 0x167   : > { %2297 = vmatpush1.bf16.msra.mxu0 %v3438_v60 }
 0x168   : > { %2298 = vmatprep.subr.bf16.mxu0 %v3443_v22 }
 0x16b   : > { %2299 = vmatpush1.bf16.msra.mxu0 %v3441_v63 }
 0x1a1   : > { %v1584_v27 = vpop.f32.mrb[32].mxu1 }
 0x1a2   : > { %v2939_v9 = vadd.f32 %v1584_v27, %v4417_v2  ;;  %v1586_v30 = vpop.f32.mrb[33].mxu1 }
 0x1a3   : > { %v2940_v10 = vadd.f32 %v1586_v30, %v4420_v4  ;;  %v1588_v15 = vpop.f32.mrb[34].mxu1 }
 0x1a4   : > { %v2941_v17 = vadd.f32 %v1588_v15, %v4417_v2  ;;  %v1590_v18 = vpop.f32.mrb[35].mxu1  ;;  %v1665_v35 = vmax.f32 %v2939_v9, 0.0 }
 0x1a5   : > { %v2942_v20 = vadd.f32 %v1590_v18, %v4420_v4  ;;  %v1666_v38 = vmax.f32 %v2940_v10, 0.0 }
 0x1a6   : > { %v1669_v23 = vmax.f32 %v2941_v17, 0.0 }
 0x1a7   : > { %v1670_v25 = vmax.f32 %v2942_v20, 0.0 }
 0x1a8   : > { %v1729_v26 = vpack.c.bf16 %v1669_v23, %v1665_v35 }
 0x1a9   : > { %v1730_v47 = vpack.c.bf16 %v1670_v25, %v1666_v38  ;;  %v1594_v16 = vpop.f32.mrb[36].mxu1 }
 0x1aa   : > { %v2943_v28 = vadd.f32 %v1594_v16, %v4417_v2  ;;  %v1596_v43 = vpop.f32.mrb[37].mxu1 }
 0x1ab   : > { %v2944_v46 = vadd.f32 %v1596_v43, %v4420_v4  ;;  %v1598_v31 = vpop.f32.mrb[38].mxu1  ;;  %2300 = vmatprep.mubr.bf16.mxu0 %v1730_v47 }
 0x1ac   : > { %v2945_v33 = vadd.f32 %v1598_v31, %v4417_v2  ;;  %v1600_v54 = vpop.f32.mrb[39].mxu1  ;;  %2301 = vmatmul.mubr.bf16.vlgmr.msra.gmra.mrb[32].mxu0 %v1729_v26  ;;  %v1673_v51 = vmax.f32 %v2943_v28, 0.0 }
 0x1ad   : > { %v2946_v61 = vadd.f32 %v1600_v54, %v4420_v4  ;;  %v1674_v32 = vmax.f32 %v2944_v46, 0.0 }
 0x1ae   : > { %v1677_v5 = vmax.f32 %v2945_v33, 0.0 }
 0x1af   : > { %v1678_v37 = vmax.f32 %v2946_v61, 0.0 }
 0x1b0   : > { %v1733_v40 = vpack.c.bf16 %v1677_v5, %v1673_v51 }
 0x1b1   : > { %v1734_v45 = vpack.c.bf16 %v1678_v37, %v1674_v32  ;;  %v1604_v49 = vpop.f32.mrb[40].mxu1 }
 0x1b2   : > { %v2947_v58 = vadd.f32 %v1604_v49, %v4417_v2  ;;  %v1606_v62 = vpop.f32.mrb[41].mxu1 }
 0x1b3   : > { %v2948_v7 = vadd.f32 %v1606_v62, %v4420_v4  ;;  %v1608_v12 = vpop.f32.mrb[42].mxu1  ;;  %2310 = vmatprep.mubr.bf16.mxu0 %v1734_v45 }
 0x1b4   : > { %v2949_v34 = vadd.f32 %v1608_v12, %v4417_v2  ;;  %v1610_v36 = vpop.f32.mrb[43].mxu1  ;;  %2311 = vmatmul.mubr.bf16.gmra.mrb[36].mxu0 %v1733_v40  ;;  %v1681_v41 = vmax.f32 %v2947_v58, 0.0 }
 0x1b5   : > { %v2950_v39 = vadd.f32 %v1610_v36, %v4420_v4  ;;  %v1682_v3 = vmax.f32 %v2948_v7, 0.0 }
 0x1b6   : > { %v1685_v42 = vmax.f32 %v2949_v34, 0.0 }
 0x1b7   : > { %v1686_v44 = vmax.f32 %v2950_v39, 0.0 }
 0x1b8   : > { %v1737_v6 = vpack.c.bf16 %v1685_v42, %v1681_v41 }
 0x1b9   : > { %v1738_v48 = vpack.c.bf16 %v1686_v44, %v1682_v3  ;;  %v1614_v50 = vpop.f32.mrb[44].mxu1 }
 0x1ba   : > { %v2951_v11 = vadd.f32 %v1614_v50, %v4417_v2  ;;  %v1616_v52 = vpop.f32.mrb[45].mxu1 }
 0x1bb   : > { %v2952_v14 = vadd.f32 %v1616_v52, %v4420_v4  ;;  %v1618_v24 = vpop.f32.mrb[46].mxu1  ;;  %2320 = vmatprep.mubr.bf16.mxu0 %v1738_v48 }
 0x1bc   : > { %v2953_v53 = vadd.f32 %v1618_v24, %v4417_v2  ;;  %v1620_v55 = vpop.f32.mrb[47].mxu1  ;;  %2321 = vmatmul.mubr.bf16.gmra.mrb[40].mxu0 %v1737_v6  ;;  %v1689_v29 = vmax.f32 %v2951_v11, 0.0 }
 0x1bd   : > { %v2954_v56 = vadd.f32 %v1620_v55, %v4420_v4  ;;  %v1690_v59 = vmax.f32 %v2952_v14, 0.0 }
 0x1be   : > { %v1693_v57 = vmax.f32 %v2953_v53, 0.0 }
 0x1bf   : > { %v1694_v19 = vmax.f32 %v2954_v56, 0.0 }
 0x1c0   : > { %v1741_v60 = vpack.c.bf16 %v1693_v57, %v1689_v29 }
 0x1c1   : > { %v1742_v22 = vpack.c.bf16 %v1694_v19, %v1690_v59  ;;  %v1624_v63 = vpop.f32.mrb[48].mxu1  ;;  %v1823_v19 = vld [vmem:[%s4750_s4] sm:$0x3] }
 0x1c2   : > { %v2955_v0 = vadd.f32 %v1624_v63, %v4417_v2  ;;  %v1626_v1 = vpop.f32.mrb[49].mxu1 }
 0x1c3   : > { %v2956_v27 = vadd.f32 %v1626_v1, %v4420_v4  ;;  %v1628_v9 = vpop.f32.mrb[50].mxu1  ;;  %2330 = vmatprep.mubr.bf16.mxu0 %v1742_v22 }
 0x1c4   : > { %v2957_v30 = vadd.f32 %v1628_v9, %v4417_v2  ;;  %v1630_v10 = vpop.f32.mrb[51].mxu1  ;;  %2331 = vmatmul.mubr.bf16.gmra.mrb[44].mxu0 %v1741_v60  ;;  %v1697_v17 = vmax.f32 %v2955_v0, 0.0  ;;  %v4459_v60 = vrot.slane %v1823_v19, %v393_v13 }
 0x1c5   : > { %v2958_v15 = vadd.f32 %v1630_v10, %v4420_v4  ;;  %v1698_v20 = vmax.f32 %v2956_v27, 0.0 }
 0x1c6   : > { %v1701_v18 = vmax.f32 %v2957_v30, 0.0 }
 0x1c7   : > { %v1702_v35 = vmax.f32 %v2958_v15, 0.0 }
 0x1c8   : > { %v1745_v23 = vpack.c.bf16 %v1701_v18, %v1697_v17 }
 0x1c9   : > { %v1746_v38 = vpack.c.bf16 %v1702_v35, %v1698_v20  ;;  %v1634_v25 = vpop.f32.mrb[52].mxu1 }
 0x1ca   : > { %v2959_v26 = vadd.f32 %v1634_v25, %v4417_v2  ;;  %v1636_v47 = vpop.f32.mrb[53].mxu1 }
 0x1cb   : > { %v2960_v16 = vadd.f32 %v1636_v47, %v4420_v4  ;;  %v1638_v28 = vpop.f32.mrb[54].mxu1  ;;  %2340 = vmatprep.mubr.bf16.mxu0 %v1746_v38 }
 0x1cc   : > { %v2961_v43 = vadd.f32 %v1638_v28, %v4417_v2  ;;  %v1640_v46 = vpop.f32.mrb[55].mxu1  ;;  %2341 = vmatmul.mubr.bf16.gmra.mrb[48].mxu0 %v1745_v23  ;;  %v1705_v33 = vmax.f32 %v2959_v26, 0.0 }
 0x1cd   : > { %v2962_v31 = vadd.f32 %v1640_v46, %v4420_v4  ;;  %v1706_v61 = vmax.f32 %v2960_v16, 0.0 }
 0x1ce   : > { %v1709_v54 = vmax.f32 %v2961_v43, 0.0 }
 0x1cf   : > { %v1710_v51 = vmax.f32 %v2962_v31, 0.0 }
 0x1d0   : > { %v1749_v5 = vpack.c.bf16 %v1709_v54, %v1705_v33 }
 0x1d1   : > { %v1750_v32 = vpack.c.bf16 %v1710_v51, %v1706_v61  ;;  %v1644_v37 = vpop.f32.mrb[56].mxu1 }
 0x1d2   : > { %v2963_v40 = vadd.f32 %v1644_v37, %v4417_v2  ;;  %v1646_v45 = vpop.f32.mrb[57].mxu1 }
 0x1d3   : > { %v2964_v49 = vadd.f32 %v1646_v45, %v4420_v4  ;;  %v1648_v58 = vpop.f32.mrb[58].mxu1  ;;  %2350 = vmatprep.mubr.bf16.mxu0 %v1750_v32 }
 0x1d4   : > { %v2965_v62 = vadd.f32 %v1648_v58, %v4417_v2  ;;  %v1650_v7 = vpop.f32.mrb[59].mxu1  ;;  %2351 = vmatmul.mubr.bf16.gmra.mrb[52].mxu0 %v1749_v5  ;;  %v1713_v34 = vmax.f32 %v2963_v40, 0.0 }
 0x1d5   : > { %v2966_v12 = vadd.f32 %v1650_v7, %v4420_v4  ;;  %v1714_v39 = vmax.f32 %v2964_v49, 0.0 }
 0x1d6   : > { %v1717_v36 = vmax.f32 %v2965_v62, 0.0 }
 0x1d7   : > { %v1718_v41 = vmax.f32 %v2966_v12, 0.0 }
 0x1d8   : > { %v1753_v42 = vpack.c.bf16 %v1717_v36, %v1713_v34 }
 0x1d9   : > { %v1754_v3 = vpack.c.bf16 %v1718_v41, %v1714_v39  ;;  %v1654_v44 = vpop.f32.mrb[60].mxu1 }
 0x1da   : > { %v2967_v6 = vadd.f32 %v1654_v44, %v4417_v2  ;;  %v1656_v48 = vpop.f32.mrb[61].mxu1 }
 0x1db   : > { %v2968_v50 = vadd.f32 %v1656_v48, %v4420_v4  ;;  %v1658_v11 = vpop.f32.mrb[62].mxu1  ;;  %2360 = vmatprep.mubr.bf16.mxu0 %v1754_v3 }
 0x1dc   : > { %v2969_v52 = vadd.f32 %v1658_v11, %v4417_v2  ;;  %v1660_v14 = vpop.f32.mrb[63].mxu1  ;;  %2361 = vmatmul.mubr.bf16.gmra.mrb[56].mxu0 %v1753_v42  ;;  %v1721_v53 = vmax.f32 %v2967_v6, 0.0  ;;  %v4463_v2 = vrot.slane %v1823_v19, %v397_v21 }
 0x1dd   : > { %v2970_v24 = vadd.f32 %v1660_v14, %v4420_v4  ;;  %v1722_v56 = vmax.f32 %v2968_v50, 0.0 }
 0x1de   : > { %v1725_v55 = vmax.f32 %v2969_v52, 0.0 }
 0x1df   : > { %v1726_v29 = vmax.f32 %v2970_v24, 0.0 }
 0x1e0   : > { %v1757_v57 = vpack.c.bf16 %v1725_v55, %v1721_v53 }
 0x1e1   : > { %v1758_v59 = vpack.c.bf16 %v1726_v29, %v1722_v56 }
 0x1e3   : > { %2370 = vmatprep.mubr.bf16.mxu0 %v1758_v59 }
 0x1e4   : > { %2371 = vmatmul.mubr.bf16.gmra.mrb[60].mxu0 %v1757_v57 }
 0x27f   : > { %v2302_v4 = vpop.f32.mrb[32].mxu0 }
 0x280   : > { %v4466_v22 = vadd.f32 %v2302_v4, %v4459_v60  ;;  %v2304_v63 = vpop.f32.mrb[33].mxu0 }
 0x281   : > { %v4469_v0 = vadd.f32 %v2304_v63, %v4463_v2  ;;  %v2306_v1 = vpop.f32.mrb[34].mxu0 }
 0x282   : > { %v4472_v27 = vadd.f32 %v2306_v1, %v4459_v60  ;;  %v2308_v9 = vpop.f32.mrb[35].mxu0  ;;  %v2381_v13 = vmul.f32 %v4466_v22, %v4466_v22 }
 0x283   : > { %v4477_v8 = vadd.f32 %v2308_v9, %v4463_v2  ;;  %v2382_v21 = vmul.f32 %v4469_v0, %v4469_v0 }
 0x284   : > { %v2383_v30 = vmul.f32 %v4472_v27, %v4472_v27 }
 0x285   : > { %v2384_v10 = vmul.f32 %v4477_v8, %v4477_v8  ;;  %v2413_v15 = vadd.f32 %v2382_v21, %v2381_v13 }
 0x287   : > { %v2312_v17 = vpop.f32.mrb[36].mxu0  ;;  %2414 = vadd.xlane.f32.xlu0 %v2413_v15  ;;  %v2416_v38 = vadd.f32 %v2384_v10, %v2383_v30 }
 0x288   : > { %v4486_v18 = vadd.f32 %v2312_v17, %v4459_v60  ;;  %v2314_v20 = vpop.f32.mrb[37].mxu0 }
 0x289   : > { %v4489_v35 = vadd.f32 %v2314_v20, %v4463_v2  ;;  %v2316_v23 = vpop.f32.mrb[38].mxu0 }
 0x28a   : > { %v4492_v25 = vadd.f32 %v2316_v23, %v4459_v60  ;;  %v2318_v26 = vpop.f32.mrb[39].mxu0  ;;  %v2385_v47 = vmul.f32 %v4486_v18, %v4486_v18 }
 0x28b   : > { %v4497_v16 = vadd.f32 %v2318_v26, %v4463_v2  ;;  %2417 = vadd.xlane.f32.xlu0 %v2416_v38  ;;  %v2386_v28 = vmul.f32 %v4489_v35, %v4489_v35 }
 0x28c   : > { %v2387_v43 = vmul.f32 %v4492_v25, %v4492_v25 }
 0x28d   : > { %v2388_v46 = vmul.f32 %v4497_v16, %v4497_v16  ;;  %v2419_v31 = vadd.f32 %v2386_v28, %v2385_v47 }
 0x28f   : > { %v2322_v33 = vpop.f32.mrb[40].mxu0  ;;  %2420 = vadd.xlane.f32.xlu1 %v2419_v31  ;;  %v2422_v32 = vadd.f32 %v2388_v46, %v2387_v43 }
 0x290   : > { %v4506_v54 = vadd.f32 %v2322_v33, %v4459_v60  ;;  %v2324_v61 = vpop.f32.mrb[41].mxu0 }
 0x291   : > { %v4509_v51 = vadd.f32 %v2324_v61, %v4463_v2  ;;  %v2326_v5 = vpop.f32.mrb[42].mxu0 }
 0x292   : > { %v2389_v37 = vmul.f32 %v4506_v54, %v4506_v54  ;;  %v4514_v40 = vadd.f32 %v2326_v5, %v4459_v60  ;;  %v2328_v45 = vpop.f32.mrb[43].mxu0 }
 0x293   : > { %v2390_v49 = vmul.f32 %v4509_v51, %v4509_v51  ;;  %v4519_v58 = vadd.f32 %v2328_v45, %v4463_v2  ;;  %2423 = vadd.xlane.f32.xlu1 %v2422_v32 }
 0x294   : > { %v2391_v62 = vmul.f32 %v4514_v40, %v4514_v40 }
 0x295   : > { %v2392_v7 = vmul.f32 %v4519_v58, %v4519_v58  ;;  %v2425_v12 = vadd.f32 %v2390_v49, %v2389_v37 }
 0x297   : > { %v2332_v34 = vpop.f32.mrb[44].mxu0  ;;  %2426 = vadd.xlane.f32.xlu0 %v2425_v12  ;;  %v2428_v36 = vadd.f32 %v2392_v7, %v2391_v62 }
 0x298   : > { %v4526_v39 = vadd.f32 %v2332_v34, %v4459_v60  ;;  %v2334_v41 = vpop.f32.mrb[45].mxu0 }
 0x299   : > { %v4529_v42 = vadd.f32 %v2334_v41, %v4463_v2  ;;  %v2336_v3 = vpop.f32.mrb[46].mxu0  ;;  %2429 = vadd.xlane.f32.xlu1 %v2428_v36 }
 0x29a   : > { %v2393_v44 = vmul.f32 %v4526_v39, %v4526_v39  ;;  %v4534_v6 = vadd.f32 %v2336_v3, %v4459_v60  ;;  %v2338_v48 = vpop.f32.mrb[47].mxu0 }
 0x29b   : > { %v2394_v50 = vmul.f32 %v4529_v42, %v4529_v42  ;;  %v4539_v11 = vadd.f32 %v2338_v48, %v4463_v2 }
 0x29c   : > { %v2395_v52 = vmul.f32 %v4534_v6, %v4534_v6 }
 0x29d   : > { %v2396_v14 = vmul.f32 %v4539_v11, %v4539_v11  ;;  %v2431_v24 = vadd.f32 %v2394_v50, %v2393_v44 }
 0x29f   : > { %v2342_v53 = vpop.f32.mrb[48].mxu0  ;;  %2432 = vadd.xlane.f32.xlu0 %v2431_v24  ;;  %v2434_v55 = vadd.f32 %v2396_v14, %v2395_v52 }
 0x2a0   : > { %v4546_v56 = vadd.f32 %v2342_v53, %v4459_v60  ;;  %v2344_v29 = vpop.f32.mrb[49].mxu0 }
 0x2a1   : > { %v4549_v57 = vadd.f32 %v2344_v29, %v4463_v2  ;;  %v2346_v59 = vpop.f32.mrb[50].mxu0  ;;  %2435 = vadd.xlane.f32.xlu1 %v2434_v55 }
 0x2a2   : > { %v2397_v19 = vmul.f32 %v4546_v56, %v4546_v56  ;;  %v4554_v4 = vadd.f32 %v2346_v59, %v4459_v60  ;;  %v2348_v63 = vpop.f32.mrb[51].mxu0 }
 0x2a3   : > { %v2398_v1 = vmul.f32 %v4549_v57, %v4549_v57  ;;  %v4559_v9 = vadd.f32 %v2348_v63, %v4463_v2 }
 0x2a4   : > { %v2399_v13 = vmul.f32 %v4554_v4, %v4554_v4 }
 0x2a5   : > { %v2400_v21 = vmul.f32 %v4559_v9, %v4559_v9  ;;  %v2437_v30 = vadd.f32 %v2398_v1, %v2397_v19 }
 0x2a7   : > { %v2352_v10 = vpop.f32.mrb[52].mxu0  ;;  %2438 = vadd.xlane.f32.xlu0 %v2437_v30  ;;  %v2440_v15 = vadd.f32 %v2400_v21, %v2399_v13 }
 0x2a8   : > { %v4566_v17 = vadd.f32 %v2352_v10, %v4459_v60  ;;  %v2354_v20 = vpop.f32.mrb[53].mxu0 }
 0x2a9   : > { %v4569_v23 = vadd.f32 %v2354_v20, %v4463_v2  ;;  %v2356_v38 = vpop.f32.mrb[54].mxu0  ;;  %2441 = vadd.xlane.f32.xlu1 %v2440_v15 }
 0x2aa   : > { %v2401_v26 = vmul.f32 %v4566_v17, %v4566_v17  ;;  %v4574_v47 = vadd.f32 %v2356_v38, %v4459_v60  ;;  %v2358_v28 = vpop.f32.mrb[55].mxu0 }
 0x2ab   : > { %v2402_v43 = vmul.f32 %v4569_v23, %v4569_v23  ;;  %v4579_v46 = vadd.f32 %v2358_v28, %v4463_v2 }
 0x2ac   : > { %v2403_v31 = vmul.f32 %v4574_v47, %v4574_v47 }
 0x2ad   : > { %v2404_v33 = vmul.f32 %v4579_v46, %v4579_v46  ;;  %v2443_v61 = vadd.f32 %v2402_v43, %v2401_v26 }
 0x2af   : > { %v2362_v5 = vpop.f32.mrb[56].mxu0  ;;  %2444 = vadd.xlane.f32.xlu0 %v2443_v61  ;;  %v2446_v32 = vadd.f32 %v2404_v33, %v2403_v31 }
 0x2b0   : > { %v4586_v37 = vadd.f32 %v2362_v5, %v4459_v60  ;;  %v2364_v45 = vpop.f32.mrb[57].mxu0 }
 0x2b1   : > { %v4589_v49 = vadd.f32 %v2364_v45, %v4463_v2  ;;  %v2366_v62 = vpop.f32.mrb[58].mxu0  ;;  %2447 = vadd.xlane.f32.xlu1 %v2446_v32 }
 0x2b2   : > { %v2405_v7 = vmul.f32 %v4586_v37, %v4586_v37  ;;  %v4594_v12 = vadd.f32 %v2366_v62, %v4459_v60  ;;  %v2368_v34 = vpop.f32.mrb[59].mxu0 }
 0x2b3   : > { %v2406_v36 = vmul.f32 %v4589_v49, %v4589_v49  ;;  %v4599_v41 = vadd.f32 %v2368_v34, %v4463_v2 }
 0x2b4   : > { %v2407_v3 = vmul.f32 %v4594_v12, %v4594_v12 }
 0x2b5   : > { %v2408_v44 = vmul.f32 %v4599_v41, %v4599_v41  ;;  %v2449_v48 = vadd.f32 %v2406_v36, %v2405_v7 }
 0x2b7   : > { %v2372_v50 = vpop.f32.mrb[60].mxu0  ;;  %2450 = vadd.xlane.f32.xlu0 %v2449_v48  ;;  %v2452_v52 = vadd.f32 %v2408_v44, %v2407_v3 }
 0x2b8   : > { %v4606_v14 = vadd.f32 %v2372_v50, %v4459_v60  ;;  %v2374_v24 = vpop.f32.mrb[61].mxu0 }
 0x2b9   : > { %v4609_v53 = vadd.f32 %v2374_v24, %v4463_v2  ;;  %v2376_v55 = vpop.f32.mrb[62].mxu0  ;;  %2453 = vadd.xlane.f32.xlu1 %v2452_v52 }
 0x2ba   : > { %v2409_v29 = vmul.f32 %v4606_v14, %v4606_v14  ;;  %v4614_v59 = vadd.f32 %v2376_v55, %v4459_v60  ;;  %v2378_v19 = vpop.f32.mrb[63].mxu0 }
 0x2bb   : > { %v2410_v63 = vmul.f32 %v4609_v53, %v4609_v53  ;;  %v4619_v1 = vadd.f32 %v2378_v19, %v4463_v2 }
 0x2bc   : > { %v2411_v13 = vmul.f32 %v4614_v59, %v4614_v59 }
 0x2bd   : > { %v2412_v21 = vmul.f32 %v4619_v1, %v4619_v1  ;;  %v2455_v30 = vadd.f32 %v2410_v63, %v2409_v29 }
 0x2bf   : > { %2456 = vadd.xlane.f32.xlu0 %v2455_v30  ;;  %v2458_v10 = vadd.f32 %v2412_v21, %v2411_v13 }
 0x2c1   : > { %2459 = vadd.xlane.f32.xlu1 %v2458_v10 }
 0x314   : > { %v2415_v60 = vpop.xlane.xlu0 %2414 }
 0x315   : > { %v2461_v15 = vmax.f32 %v2415_v60, 1e-24 }
 0x317   : > { %3444 = vrsqrt.f32 %v2461_v15 }
 0x318   : > { %v2418_v20 = vpop.xlane.xlu0 %2417 }
 0x319   : > { %v2462_v38 = vmax.f32 %v2418_v20, 1e-24 }
 0x31b   : > { %3446 = vrsqrt.f32 %v2462_v38 }
 0x31c   : > { %v2421_v2 = vpop.xlane.xlu1 %2420 }
 0x31d   : > { %v2463_v26 = vmax.f32 %v2421_v2, 1e-24 }
 0x31f   : > { %3448 = vrsqrt.f32 %v2463_v26 }
 0x320   : > { %v2424_v28 = vpop.xlane.xlu1 %2423 }
 0x321   : > { %v3445_v43 = vpop.eup %3444  ;;  %v2464_v31 = vmax.f32 %v2424_v28, 1e-24 }
 0x322   : > { %v2493_v33 = vmul.f32 %v3445_v43, %v4466_v22  ;;  %v2494_v61 = vmul.f32 %v3445_v43, %v4469_v0 }
 0x323   : > { %3450 = vrsqrt.f32 %v2464_v31 }
 0x324   : > { %2525 = vst [vmem:[%s4630_s8] sm:$0xff] %v2493_v33  ;;  %2526 = vst [vmem:[%s4630_s8 + $0x8] sm:$0xff] %v2494_v61  ;;  %v2427_v5 = vpop.xlane.xlu0 %2426 }
 0x325   : > { %v3447_v32 = vpop.eup %3446  ;;  %v2465_v45 = vmax.f32 %v2427_v5, 1e-24 }
 0x326   : > { %v2495_v62 = vmul.f32 %v3447_v32, %v4472_v27  ;;  %v2496_v22 = vmul.f32 %v3447_v32, %v4477_v8  ;;  %v2430_v7 = vpop.xlane.xlu1 %2429 }
 0x327   : > { %3452 = vrsqrt.f32 %v2465_v45  ;;  %v2466_v0 = vmax.f32 %v2430_v7, 1e-24 }
 0x328   : > { %2527 = vst [vmem:[%s4630_s8 + $0x10] sm:$0xff] %v2495_v62  ;;  %2528 = vst [vmem:[%s4630_s8 + $0x18] sm:$0xff] %v2496_v22 }
 0x329   : > { %v3449_v34 = vpop.eup %3448  ;;  %3454 = vrsqrt.f32 %v2466_v0 }
 0x32a   : > { %v2497_v36 = vmul.f32 %v3449_v34, %v4486_v18  ;;  %v2498_v3 = vmul.f32 %v3449_v34, %v4489_v35 }
 0x32c   : > { %2529 = vst [vmem:[%s4630_s8 + $0x20] sm:$0xff] %v2497_v36  ;;  %2530 = vst [vmem:[%s4630_s8 + $0x28] sm:$0xff] %v2498_v3  ;;  %v2433_v44 = vpop.xlane.xlu0 %2432 }
 0x32d   : > { %v3451_v27 = vpop.eup %3450  ;;  %v2467_v8 = vmax.f32 %v2433_v44, 1e-24 }
 0x32e   : > { %v2499_v48 = vmul.f32 %v3451_v27, %v4492_v25  ;;  %v2500_v50 = vmul.f32 %v3451_v27, %v4497_v16  ;;  %v2436_v52 = vpop.xlane.xlu1 %2435 }
 0x32f   : > { %3456 = vrsqrt.f32 %v2467_v8  ;;  %v2468_v24 = vmax.f32 %v2436_v52, 1e-24 }
 0x330   : > { %2531 = vst [vmem:[%s4630_s8 + $0x30] sm:$0xff] %v2499_v48  ;;  %2532 = vst [vmem:[%s4630_s8 + $0x38] sm:$0xff] %v2500_v50 }
 0x331   : > { %v3453_v18 = vpop.eup %3452  ;;  %3458 = vrsqrt.f32 %v2468_v24 }
 0x332   : > { %v2501_v35 = vmul.f32 %v3453_v18, %v4506_v54  ;;  %v2502_v55 = vmul.f32 %v3453_v18, %v4509_v51 }
 0x333   : > { %v3455_v29 = vpop.eup %3454 }
 0x334   : > { %2533 = vst [vmem:[%s4630_s8 + $0x40] sm:$0xff] %v2501_v35  ;;  %2534 = vst [vmem:[%s4630_s8 + $0x48] sm:$0xff] %v2502_v55  ;;  %v2503_v25 = vmul.f32 %v3455_v29, %v4514_v40  ;;  %v2504_v16 = vmul.f32 %v3455_v29, %v4519_v58  ;;  %v2439_v19 = vpop.xlane.xlu0 %2438 }
 0x335   : > { %v2469_v63 = vmax.f32 %v2439_v19, 1e-24 }
 0x336   : > { %2535 = vst [vmem:[%s4630_s8 + $0x50] sm:$0xff] %v2503_v25  ;;  %2536 = vst [vmem:[%s4630_s8 + $0x58] sm:$0xff] %v2504_v16  ;;  %v2442_v13 = vpop.xlane.xlu1 %2441 }
 0x337   : > { %3460 = vrsqrt.f32 %v2469_v63  ;;  %v2470_v54 = vmax.f32 %v2442_v13, 1e-24 }
 0x339   : > { %v3457_v21 = vpop.eup %3456  ;;  %3462 = vrsqrt.f32 %v2470_v54 }
 0x33a   : > { %v2505_v51 = vmul.f32 %v3457_v21, %v4526_v39  ;;  %v2506_v30 = vmul.f32 %v3457_v21, %v4529_v42 }
 0x33b   : > { %v3459_v10 = vpop.eup %3458 }
 0x33c   : > { %2537 = vst [vmem:[%s4630_s8 + $0x60] sm:$0xff] %v2505_v51  ;;  %2538 = vst [vmem:[%s4630_s8 + $0x68] sm:$0xff] %v2506_v30  ;;  %v2507_v40 = vmul.f32 %v3459_v10, %v4534_v6  ;;  %v2508_v58 = vmul.f32 %v3459_v10, %v4539_v11  ;;  %v2445_v60 = vpop.xlane.xlu0 %2444 }
 0x33d   : > { %v2471_v15 = vmax.f32 %v2445_v60, 1e-24 }
 0x33e   : > { %2539 = vst [vmem:[%s4630_s8 + $0x70] sm:$0xff] %v2507_v40  ;;  %2540 = vst [vmem:[%s4630_s8 + $0x78] sm:$0xff] %v2508_v58  ;;  %v2448_v20 = vpop.xlane.xlu1 %2447 }
 0x33f   : > { %3464 = vrsqrt.f32 %v2471_v15  ;;  %v2472_v39 = vmax.f32 %v2448_v20, 1e-24 }
 0x341   : > { %v3461_v38 = vpop.eup %3460  ;;  %3466 = vrsqrt.f32 %v2472_v39 }
 0x342   : > { %v2509_v42 = vmul.f32 %v3461_v38, %v4546_v56  ;;  %v2510_v2 = vmul.f32 %v3461_v38, %v4549_v57 }
 0x343   : > { %v3463_v26 = vpop.eup %3462 }
 0x344   : > { %2541 = vst [vmem:[%s4630_s8 + $0x80] sm:$0xff] %v2509_v42  ;;  %2542 = vst [vmem:[%s4630_s8 + $0x88] sm:$0xff] %v2510_v2  ;;  %v2511_v6 = vmul.f32 %v3463_v26, %v4554_v4  ;;  %v2512_v11 = vmul.f32 %v3463_v26, %v4559_v9  ;;  %v2451_v28 = vpop.xlane.xlu0 %2450 }
 0x345   : > { %v2473_v43 = vmax.f32 %v2451_v28, 1e-24 }
 0x346   : > { %2543 = vst [vmem:[%s4630_s8 + $0x90] sm:$0xff] %v2511_v6  ;;  %2544 = vst [vmem:[%s4630_s8 + $0x98] sm:$0xff] %v2512_v11  ;;  %v2454_v31 = vpop.xlane.xlu1 %2453 }
 0x347   : > { %3468 = vrsqrt.f32 %v2473_v43  ;;  %v2474_v56 = vmax.f32 %v2454_v31, 1e-24 }
 0x349   : > { %v3465_v33 = vpop.eup %3464  ;;  %3470 = vrsqrt.f32 %v2474_v56 }
 0x34a   : > { %v2513_v57 = vmul.f32 %v3465_v33, %v4566_v17  ;;  %v2514_v61 = vmul.f32 %v3465_v33, %v4569_v23 }
 0x34b   : > { %v3467_v5 = vpop.eup %3466 }
 0x34c   : > { %2545 = vst [vmem:[%s4630_s8 + $0xa0] sm:$0xff] %v2513_v57  ;;  %2546 = vst [vmem:[%s4630_s8 + $0xa8] sm:$0xff] %v2514_v61  ;;  %v2515_v4 = vmul.f32 %v3467_v5, %v4574_v47  ;;  %v2516_v9 = vmul.f32 %v3467_v5, %v4579_v46  ;;  %v2457_v32 = vpop.xlane.xlu0 %2456 }
 0x34d   : > { %v2475_v45 = vmax.f32 %v2457_v32, 1e-24 }
 0x34e   : > { %2547 = vst [vmem:[%s4630_s8 + $0xb0] sm:$0xff] %v2515_v4  ;;  %2548 = vst [vmem:[%s4630_s8 + $0xb8] sm:$0xff] %v2516_v9  ;;  %v2460_v17 = vpop.xlane.xlu1 %2459 }
 0x34f   : > { %3472 = vrsqrt.f32 %v2475_v45  ;;  %v2476_v23 = vmax.f32 %v2460_v17, 1e-24 }
 0x351   : > { %v3469_v62 = vpop.eup %3468  ;;  %3474 = vrsqrt.f32 %v2476_v23 }
 0x352   : > { %v2517_v22 = vmul.f32 %v3469_v62, %v4586_v37  ;;  %v2518_v7 = vmul.f32 %v3469_v62, %v4589_v49 }
 0x353   : > { %v3471_v47 = vpop.eup %3470 }
 0x354   : > { %2549 = vst [vmem:[%s4630_s8 + $0xc0] sm:$0xff] %v2517_v22  ;;  %2550 = vst [vmem:[%s4630_s8 + $0xc8] sm:$0xff] %v2518_v7  ;;  %v2519_v46 = vmul.f32 %v3471_v47, %v4594_v12  ;;  %v2520_v0 = vmul.f32 %v3471_v47, %v4599_v41 }
 0x356   : > { %2551 = vst [vmem:[%s4630_s8 + $0xd0] sm:$0xff] %v2519_v46  ;;  %2552 = vst [vmem:[%s4630_s8 + $0xd8] sm:$0xff] %v2520_v0 }
 0x359   : > { %v3473_v37 = vpop.eup %3472 }
 0x35a   : > { %v2521_v49 = vmul.f32 %v3473_v37, %v4606_v14  ;;  %v2522_v34 = vmul.f32 %v3473_v37, %v4609_v53 }
 0x35b   : > { %v3475_v36 = vpop.eup %3474 }
 0x35c   : > { %2553 = vst [vmem:[%s4630_s8 + $0xe0] sm:$0xff] %v2521_v49  ;;  %2554 = vst [vmem:[%s4630_s8 + $0xe8] sm:$0xff] %v2522_v34  ;;  %v2523_v12 = vmul.f32 %v3475_v36, %v4614_v59  ;;  %v2524_v41 = vmul.f32 %v3475_v36, %v4619_v1 }
 0x35e   : > { %2555 = vst [vmem:[%s4630_s8 + $0xf0] sm:$0xff] %v2523_v12  ;;  %2556 = vst [vmem:[%s4630_s8 + $0xf8] sm:$0xff] %v2524_v41 }
 0x35f   : > { %3489 = shalt.err (!%p3486_p3)
}
 0x360   : > { %s3490_s17 = scalar_lea.hbm %s4693_s13, 4096  ;;  %s3494_s30 = scalar_lea.hbm %s4751_s5, 8192 }
 0x361   : > { %p3491_p4 = scmp.ne.s32.totalorder %s4693_s13, %s3490_s17  ;;  %p3495_p9 = scmp.lt.u32.totalorder %s4693_s13, %s4751_s5 }
 0x362   : > { %p3496_p10 = scmp.lt.u32.totalorder %s3494_s30, %s3490_s17  ;;  %p3498_p12 = scmp.lt.u32.totalorder %s3490_s17, %s4693_s13 }
 0x363   : > { %p3492_p7 = pnand %p3491_p4, %p3611_p5 }
 0x364   : > { %p3497_p11 = por %p3496_p10, %p3495_p9 }
 0x365   : > { %p3493_p8 = pneg %p3492_p7 }
 0x366   : > { %p3499_p13 = por %p3498_p12, %p3497_p11 }
 0x368   : > { %p3500_p0 = pnand %p3499_p13, %p3493_p8 }
 0x36a   : > { %3503 = shalt.err (!%p3500_p0)
}
 0x36b   : > { %s3541_s8 = smov 256   ;;  %s3542_s9 = smov 16  }
 0x36c   : > { %3067 = dma.vmem_to_hbm [thread:$0]  (%p3611_p5), %s4695_s10, 4096, %s4693_s13, %s4705_s22, %s3541_s8, %s3541_s8, %s3542_s9  }
 0x36d PF: > { %p3073_p1 = scmp.ge.s32.totalorder %s3538_s21, 2  ;;  %s2587_s11 = sand.u32 1, %s3526_s18  }
 0x36e   : > { %s2588_s12 = scalar_lea.sflag [#allocation3], %s2587_s11 }
 0x36f   : > { %p3070_p2 = pnand %p3073_p1, %p3615_p6 }
 0x371   : > { %3521 = dma.done.wait (!%p3070_p2), %s2588_s12, 4096  }
 0x372   : > { %3523 = vsyncadd (!%p3070_p2), %s2588_s12, 4294963200  ;;  %p15_p3 = scmp.ge.s32.totalorder %s3598_s24, 4   ;;  %s4754_s18 = smov %s3530_s19 }
 0x373   : > { %s4755_s19 = smov %s3534_s20  ;;  %s4756_s20 = smov %s3609_s27 }
 0x374   : > { %s4757_s21 = smov %s3598_s24  ;;  %17 = sbr.rel (!%p15_p3) target bundleno = 3 (0x3), region = 75 }
 0x37b   :  { %2593 = vsyncpa [#allocation3], 1 }
 0x37c   :  { %2595 = vsyncpa [#allocation3 + $0x1], 1 }

</bundles_post_ra>
